<compile_context>
chip_gen: v7x
topology: tpu7x:2x2x1
jax: 0.10.0
libtpu: 0.0.40
codegen_flags: <defaults>
</compile_context>

<pallas_src>
import numpy as np
import jax
import jax.numpy as jnp
from jax.experimental import pallas as pl
from jax.experimental.pallas import tpu as pltpu

BN_EPS = 1e-5
H1, H2, H3 = 1000, 500, 100            # hidden sizes fixed by the module
H1P, H2P, H3P = 1024, 512, 128         # lane-padded hidden sizes
COLS_PAD = 128                         # 4 clinical columns, lane-padded


def _round_up(n, m):
    return (n + m - 1) // m * m


# --------------------------------------------------------------------------
# Kernel: one batch tile of the folded 4-layer MLP (bf16 weights, f32 acts).
# --------------------------------------------------------------------------
def _survnet_kernel(x_ref, cols_ref,
                    w1_ref, b1_ref,
                    w2a_ref, w2b_ref, b2_ref,
                    w3_ref, b3_ref,
                    w4_ref, b4_ref,
                    out_ref):
    def mm(h, w_ref):
        # cast activation to bf16 only at the dot; accumulate in f32 on MXU
        return jnp.dot(h.astype(jnp.bfloat16), w_ref[...],
                       preferred_element_type=jnp.float32)

    # fc1 -> relu            (BN1 is folded forward into fc2's weights/bias)
    h = jnp.maximum(mm(x_ref[...], w1_ref) + b1_ref[...], 0.0)
    # fc2 on [BN1(h), cols]  (BN1 scale/shift already baked into w2a / b2)
    h = jnp.maximum(mm(h, w2a_ref) + mm(cols_ref[...], w2b_ref) + b2_ref[...], 0.0)
    # fc3                    (BN2 folded into w3 / b3)
    h = jnp.maximum(mm(h, w3_ref) + b3_ref[...], 0.0)
    # fc4                    (BN3 folded into w4 / b4)
    out_ref[...] = mm(h, w4_ref) + b4_ref[...]


# --------------------------------------------------------------------------
# Parameter construction: raw (unfolded, f32) params, then fold + pad + bf16.
# --------------------------------------------------------------------------
def init_raw_params(key, in_features, out_features):
    """Deterministic PyTorch-style init of the original module parameters."""
    keys = iter(jax.random.split(key, 32))

    def linear(fan_in, fan_out):
        bound = 1.0 / np.sqrt(fan_in)
        w = jax.random.uniform(next(keys), (fan_in, fan_out), jnp.float32, -bound, bound)
        b = jax.random.uniform(next(keys), (1, fan_out), jnp.float32, -bound, bound)
        return w, b

    def bn(dim):
        g = jax.random.uniform(next(keys), (1, dim), jnp.float32, 0.5, 1.5)
        be = 0.1 * jax.random.normal(next(keys), (1, dim), jnp.float32)
        m = 0.1 * jax.random.normal(next(keys), (1, dim), jnp.float32)
        v = jax.random.uniform(next(keys), (1, dim), jnp.float32, 0.5, 1.5)
        return g, be, m, v

    w1, b1 = linear(in_features, H1)
    bn1 = bn(H1)
    w2, b2 = linear(H1 + 4, H2)   # rows 0..999 image features, rows 1000..1003 clinical cols
    bn2 = bn(H2)
    w3, b3 = linear(H2, H3)
    bn3 = bn(H3)
    w4, b4 = linear(H3, out_features)
    return dict(w1=w1, b1=b1, bn1=bn1, w2=w2, b2=b2, bn2=bn2,
                w3=w3, b3=b3, bn3=bn3, w4=w4, b4=b4)


def fold_and_pack(raw, in_features, out_features):
    """Fold eval-mode BNs into the next Linear, pad to (8,128) tiles, cast weights to bf16."""
    Fp = _round_up(in_features, 128)
    Op = _round_up(out_features, 128)

    def bn_affine(p):
        g, be, m, v = p
        s = g * jax.lax.rsqrt(v + BN_EPS)   # (1, dim)
        t = be - m * s                      # (1, dim)
        return s, t

    def pad_w(w, ip, op):
        return jnp.zeros((ip, op), jnp.float32).at[:w.shape[0], :w.shape[1]].set(w)

    def pad_b(b, op):
        return jnp.zeros((1, op), jnp.float32).at[:, :b.shape[1]].set(b)

    s1, t1 = bn_affine(raw['bn1'])
    s2, t2 = bn_affine(raw['bn2'])
    s3, t3 = bn_affine(raw['bn3'])

    # fc1 (unchanged; its BN is folded into fc2 below)
    w1 = pad_w(raw['w1'], Fp, H1P)
    b1 = pad_b(raw['b1'], H1P)

    # fc2: image part gets BN1 folded in; clinical-cols part bypasses BN1
    w2a = pad_w(raw['w2'][:H1] * s1.T, H1P, H2P)
    w2b = pad_w(raw['w2'][H1:], COLS_PAD, H2P)
    b2 = pad_b(raw['b2'] + t1 @ raw['w2'][:H1], H2P)

    # fc3 with BN2 folded in
    w3 = pad_w(raw['w3'] * s2.T, H2P, H3P)
    b3 = pad_b(raw['b3'] + t2 @ raw['w3'], H3P)

    # fc4 with BN3 folded in
    w4 = pad_w(raw['w4'] * s3.T, H3P, Op)
    b4 = pad_b(raw['b4'] + t3 @ raw['w4'], Op)

    bf16 = lambda w: w.astype(jnp.bfloat16)
    return (bf16(w1), b1, bf16(w2a), bf16(w2b), b2, bf16(w3), b3, bf16(w4), b4)


# --------------------------------------------------------------------------
# Wrapper: 1-D batch grid, weights VMEM-resident via constant index_maps.
# --------------------------------------------------------------------------
def survnet_2_7_forward(params, imfeat, col1, col2, col3, col4, out_features,
                        batch_tile=256):
    w1, b1, w2a, w2b, b2, w3, b3, w4, b4 = params
    B, F = imfeat.shape
    Fp = w1.shape[0]
    Op = w4.shape[1]

    cols = jnp.concatenate([col1, col2, col3, col4], axis=1).astype(jnp.float32)

    tile = min(batch_tile, _round_up(B, 8))
    Bp = _round_up(B, tile)
    x_p = jnp.zeros((Bp, Fp), jnp.float32).at[:B, :F].set(imfeat)
    cols_p = jnp.zeros((Bp, COLS_PAD), jnp.float32).at[:B, :4].set(cols)

    def batch_spec(width):
        return pl.BlockSpec((tile, width), lambda i: (i, 0))

    def const_spec(shape):
        return pl.BlockSpec(shape, lambda i: (0, 0))

    out = pl.pallas_call(
        _survnet_kernel,
        out_shape=jax.ShapeDtypeStruct((Bp, Op), jnp.float32),
        grid=(Bp // tile,),
        in_specs=[
            batch_spec(Fp), batch_spec(COLS_PAD),
            const_spec(w1.shape), const_spec(b1.shape),
            const_spec(w2a.shape), const_spec(w2b.shape), const_spec(b2.shape),
            const_spec(w3.shape), const_spec(b3.shape),
            const_spec(w4.shape), const_spec(b4.shape),
        ],
        out_specs=batch_spec(Op),
        compiler_params=pltpu.CompilerParams(
            dimension_semantics=("parallel",)),
    )(x_p, cols_p, w1, b1, w2a, w2b, b2, w3, b3, w4, b4)

    return out[:B, :out_features]


# --------------------------------------------------------------------------
# References.
# --------------------------------------------------------------------------
def _reference_forward_folded(params, imfeat, col1, col2, col3, col4, out_features):
    """Plain-JAX mirror of the kernel math on the exact packed bf16/f32 params."""
    w1, b1, w2a, w2b, b2, w3, b3, w4, b4 = params
    B, F = imfeat.shape
    x = jnp.zeros((B, w1.shape[0]), jnp.float32).at[:, :F].set(imfeat)
    cols = jnp.zeros((B, COLS_PAD), jnp.float32).at[:, :4].set(
        jnp.concatenate([col1, col2, col3, col4], axis=1))

    def mm(h, w):
        return jnp.dot(h.astype(jnp.bfloat16), w, preferred_element_type=jnp.float32)

    h = jnp.maximum(mm(x, w1) + b1, 0.0)
    h = jnp.maximum(mm(h, w2a) + mm(cols, w2b) + b2, 0.0)
    h = jnp.maximum(mm(h, w3) + b3, 0.0)
    return (mm(h, w4) + b4)[:, :out_features]


def _reference_forward_original(raw, imfeat, col1, col2, col3, col4):
    """Original module semantics (eval mode), unfolded f32 parameters."""
    def bn(h, p):
        g, be, m, v = p
        return (h - m) * jax.lax.rsqrt(v + BN_EPS) * g + be

    cols = jnp.concatenate([col1, col2, col3, col4], axis=1)
    h = bn(jnp.maximum(imfeat @ raw['w1'] + raw['b1'], 0.0), raw['bn1'])
    merged = jnp.concatenate([h, cols], axis=1)
    h = bn(jnp.maximum(merged @ raw['w2'] + raw['b2'], 0.0), raw['bn2'])
    h = bn(jnp.maximum(h @ raw['w3'] + raw['b3'], 0.0), raw['bn3'])
    return h @ raw['w4'] + raw['b4']


if __name__ == "__main__":
    B, IN_FEATURES, OUT_FEATURES = 4, 244, 15  # 244 image features, 15 durations

    key = jax.random.PRNGKey(0)
    k_x, k_c, k_p = jax.random.split(key, 3)
    imfeat = jax.random.normal(k_x, (B, IN_FEATURES), jnp.float32)
    ck = jax.random.split(k_c, 4)
    col1, col2, col3, col4 = (jax.random.normal(k, (B, 1), jnp.float32) for k in ck)

    raw = init_raw_params(k_p, IN_FEATURES, OUT_FEATURES)
    params = fold_and_pack(raw, IN_FEATURES, OUT_FEATURES)

    out = survnet_2_7_forward(params, imfeat, col1, col2, col3, col4, OUT_FEATURES)
    out = jax.block_until_ready(out)
    assert out.shape == (B, OUT_FEATURES), out.shape

    # Tight check: identical folded bf16 params, identical math, plain JAX.
    ref_folded = _reference_forward_folded(params, imfeat, col1, col2, col3, col4,
                                           OUT_FEATURES)
    np.testing.assert_allclose(np.asarray(out), np.asarray(ref_folded),
                               rtol=2e-3, atol=2e-3)

    # Semantic check vs the original (unfolded, f32) module math; loose
    # tolerance accounts for bf16 weight quantization.
    ref_orig = _reference_forward_original(raw, imfeat, col1, col2, col3, col4)
    np.testing.assert_allclose(np.asarray(out), np.asarray(ref_orig),
                               rtol=0.1, atol=0.15)

    print("KERNEL_OK")
</pallas_src>

<mosaic_0001>
module attributes {stable_mosaic.version = 11 : i64} {
  func.func @_survnet_kernel(%arg0: i32, %arg1: memref<8x256xf32, #tpu.memory_space<vmem>>, %arg2: memref<8x128xf32, #tpu.memory_space<vmem>>, %arg3: memref<256x1024xbf16, #tpu.memory_space<vmem>>, %arg4: memref<1x1024xf32, #tpu.memory_space<vmem>>, %arg5: memref<1024x512xbf16, #tpu.memory_space<vmem>>, %arg6: memref<128x512xbf16, #tpu.memory_space<vmem>>, %arg7: memref<1x512xf32, #tpu.memory_space<vmem>>, %arg8: memref<512x128xbf16, #tpu.memory_space<vmem>>, %arg9: memref<1x128xf32, #tpu.memory_space<vmem>>, %arg10: memref<128x128xbf16, #tpu.memory_space<vmem>>, %arg11: memref<1x128xf32, #tpu.memory_space<vmem>>, %arg12: memref<8x128xf32, #tpu.memory_space<vmem>>) attributes {dimension_semantics = [#tpu.dimension_semantics<parallel>], iteration_bounds = array<i64: 1>, scalar_prefetch = 0 : i64, scratch_operands = 0 : i64, tpu.core_type = #tpu.core_type<tc>, window_params = [{transform_indices = @transform_0, window_bounds = array<i64: 8, 256>}, {transform_indices = @transform_1, window_bounds = array<i64: 8, 128>}, {pipeline_mode = #tpu.pipeline_mode<synchronous>, transform_indices = @transform_2, window_bounds = array<i64: 256, 1024>}, {pipeline_mode = #tpu.pipeline_mode<synchronous>, transform_indices = @transform_3, window_bounds = array<i64: 1, 1024>}, {pipeline_mode = #tpu.pipeline_mode<synchronous>, transform_indices = @transform_4, window_bounds = array<i64: 1024, 512>}, {pipeline_mode = #tpu.pipeline_mode<synchronous>, transform_indices = @transform_5, window_bounds = array<i64: 128, 512>}, {pipeline_mode = #tpu.pipeline_mode<synchronous>, transform_indices = @transform_6, window_bounds = array<i64: 1, 512>}, {pipeline_mode = #tpu.pipeline_mode<synchronous>, transform_indices = @transform_7, window_bounds = array<i64: 512, 128>}, {pipeline_mode = #tpu.pipeline_mode<synchronous>, transform_indices = @transform_8, window_bounds = array<i64: 1, 128>}, {pipeline_mode = #tpu.pipeline_mode<synchronous>, transform_indices = @transform_9, window_bounds = array<i64: 128, 128>}, {pipeline_mode = #tpu.pipeline_mode<synchronous>, transform_indices = @transform_10, window_bounds = array<i64: 1, 128>}, {transform_indices = @transform_11, window_bounds = array<i64: 8, 128>}]} {
    %c0 = arith.constant 0 : index
    %c0_0 = arith.constant 0 : index
    %0 = vector.load %arg1[%c0, %c0_0] : memref<8x256xf32, #tpu.memory_space<vmem>>, vector<8x256xf32>
    %1 = arith.truncf %0 : vector<8x256xf32> to vector<8x256xbf16>
    %c0_1 = arith.constant 0 : index
    %c0_2 = arith.constant 0 : index
    %2 = vector.load %arg3[%c0_1, %c0_2] : memref<256x1024xbf16, #tpu.memory_space<vmem>>, vector<256x1024xbf16>
    %cst = arith.constant dense<0.000000e+00> : vector<8x1024xf32>
    %3 = tpu.matmul %1, %2, %cst {dimension_numbers = #tpu.dot_dimension_numbers<[1], [0], [0], [1], [0, 0, 1, 1], [], []>} : vector<8x256xbf16>, vector<256x1024xbf16>, vector<8x1024xf32> -> vector<8x1024xf32>
    %c0_3 = arith.constant 0 : index
    %c0_4 = arith.constant 0 : index
    %4 = vector.load %arg4[%c0_3, %c0_4] : memref<1x1024xf32, #tpu.memory_space<vmem>>, vector<1x1024xf32>
    %5 = vector.broadcast %4 : vector<1x1024xf32> to vector<8x1024xf32>
    %6 = arith.addf %3, %5 : vector<8x1024xf32>
    %cst_5 = arith.constant 0.000000e+00 : f32
    %7 = vector.broadcast %cst_5 : f32 to vector<8x1024xf32>
    %8 = arith.maximumf %6, %7 : vector<8x1024xf32>
    %9 = arith.truncf %8 : vector<8x1024xf32> to vector<8x1024xbf16>
    %c0_6 = arith.constant 0 : index
    %c0_7 = arith.constant 0 : index
    %10 = vector.load %arg5[%c0_6, %c0_7] : memref<1024x512xbf16, #tpu.memory_space<vmem>>, vector<1024x512xbf16>
    %cst_8 = arith.constant dense<0.000000e+00> : vector<8x512xf32>
    %11 = tpu.matmul %9, %10, %cst_8 {dimension_numbers = #tpu.dot_dimension_numbers<[1], [0], [0], [1], [0, 0, 1, 1], [], []>} : vector<8x1024xbf16>, vector<1024x512xbf16>, vector<8x512xf32> -> vector<8x512xf32>
    %c0_9 = arith.constant 0 : index
    %c0_10 = arith.constant 0 : index
    %12 = vector.load %arg2[%c0_9, %c0_10] : memref<8x128xf32, #tpu.memory_space<vmem>>, vector<8x128xf32>
    %13 = arith.truncf %12 : vector<8x128xf32> to vector<8x128xbf16>
    %c0_11 = arith.constant 0 : index
    %c0_12 = arith.constant 0 : index
    %14 = vector.load %arg6[%c0_11, %c0_12] : memref<128x512xbf16, #tpu.memory_space<vmem>>, vector<128x512xbf16>
    %cst_13 = arith.constant dense<0.000000e+00> : vector<8x512xf32>
    %15 = tpu.matmul %13, %14, %cst_13 {dimension_numbers = #tpu.dot_dimension_numbers<[1], [0], [0], [1], [0, 0, 1, 1], [], []>} : vector<8x128xbf16>, vector<128x512xbf16>, vector<8x512xf32> -> vector<8x512xf32>
    %16 = arith.addf %11, %15 : vector<8x512xf32>
    %c0_14 = arith.constant 0 : index
    %c0_15 = arith.constant 0 : index
    %17 = vector.load %arg7[%c0_14, %c0_15] : memref<1x512xf32, #tpu.memory_space<vmem>>, vector<1x512xf32>
    %18 = vector.broadcast %17 : vector<1x512xf32> to vector<8x512xf32>
    %19 = arith.addf %16, %18 : vector<8x512xf32>
    %cst_16 = arith.constant 0.000000e+00 : f32
    %20 = vector.broadcast %cst_16 : f32 to vector<8x512xf32>
    %21 = arith.maximumf %19, %20 : vector<8x512xf32>
    %22 = arith.truncf %21 : vector<8x512xf32> to vector<8x512xbf16>
    %c0_17 = arith.constant 0 : index
    %c0_18 = arith.constant 0 : index
    %23 = vector.load %arg8[%c0_17, %c0_18] : memref<512x128xbf16, #tpu.memory_space<vmem>>, vector<512x128xbf16>
    %cst_19 = arith.constant dense<0.000000e+00> : vector<8x128xf32>
    %24 = tpu.matmul %22, %23, %cst_19 {dimension_numbers = #tpu.dot_dimension_numbers<[1], [0], [0], [1], [0, 0, 1, 1], [], []>} : vector<8x512xbf16>, vector<512x128xbf16>, vector<8x128xf32> -> vector<8x128xf32>
    %c0_20 = arith.constant 0 : index
    %c0_21 = arith.constant 0 : index
    %25 = vector.load %arg9[%c0_20, %c0_21] : memref<1x128xf32, #tpu.memory_space<vmem>>, vector<1x128xf32>
    %26 = vector.broadcast %25 : vector<1x128xf32> to vector<8x128xf32>
    %27 = arith.addf %24, %26 : vector<8x128xf32>
    %cst_22 = arith.constant 0.000000e+00 : f32
    %28 = vector.broadcast %cst_22 : f32 to vector<8x128xf32>
    %29 = arith.maximumf %27, %28 : vector<8x128xf32>
    %30 = arith.truncf %29 : vector<8x128xf32> to vector<8x128xbf16>
    %c0_23 = arith.constant 0 : index
    %c0_24 = arith.constant 0 : index
    %31 = vector.load %arg10[%c0_23, %c0_24] : memref<128x128xbf16, #tpu.memory_space<vmem>>, vector<128x128xbf16>
    %cst_25 = arith.constant dense<0.000000e+00> : vector<8x128xf32>
    %32 = tpu.matmul %30, %31, %cst_25 {dimension_numbers = #tpu.dot_dimension_numbers<[1], [0], [0], [1], [0, 0, 1, 1], [], []>} : vector<8x128xbf16>, vector<128x128xbf16>, vector<8x128xf32> -> vector<8x128xf32>
    %c0_26 = arith.constant 0 : index
    %c0_27 = arith.constant 0 : index
    %33 = vector.load %arg11[%c0_26, %c0_27] : memref<1x128xf32, #tpu.memory_space<vmem>>, vector<1x128xf32>
    %34 = vector.broadcast %33 : vector<1x128xf32> to vector<8x128xf32>
    %35 = arith.addf %32, %34 : vector<8x128xf32>
    %c0_28 = arith.constant 0 : index
    %c0_29 = arith.constant 0 : index
    %36 = vector.load %arg12[%c0_28, %c0_29] : memref<8x128xf32, #tpu.memory_space<vmem>>, vector<8x128xf32>
    tpu.vector_store %arg12[%c0_28, %c0_29], %35 {strides = array<i32>} : memref<8x128xf32, #tpu.memory_space<vmem>>, vector<8x128xf32>,
    return
  }
  func.func @transform_0(%arg0: i32) -> (i32, i32) {
    %c0_i32 = arith.constant 0 : i32
    %c0_i32_0 = arith.constant 0 : i32
    return %arg0, %c0_i32 : i32, i32
  }
  func.func @transform_1(%arg0: i32) -> (i32, i32) {
    %c0_i32 = arith.constant 0 : i32
    %c0_i32_0 = arith.constant 0 : i32
    return %arg0, %c0_i32 : i32, i32
  }
  func.func @transform_2(%arg0: i32) -> (i32, i32) {
    %c0_i32 = arith.constant 0 : i32
    %c0_i32_0 = arith.constant 0 : i32
    %c0_i32_1 = arith.constant 0 : i32
    return %c0_i32, %c0_i32_0 : i32, i32
  }
  func.func @transform_3(%arg0: i32) -> (i32, i32) {
    %c0_i32 = arith.constant 0 : i32
    %c0_i32_0 = arith.constant 0 : i32
    %c0_i32_1 = arith.constant 0 : i32
    return %c0_i32, %c0_i32_0 : i32, i32
  }
  func.func @transform_4(%arg0: i32) -> (i32, i32) {
    %c0_i32 = arith.constant 0 : i32
    %c0_i32_0 = arith.constant 0 : i32
    %c0_i32_1 = arith.constant 0 : i32
    return %c0_i32, %c0_i32_0 : i32, i32
  }
  func.func @transform_5(%arg0: i32) -> (i32, i32) {
    %c0_i32 = arith.constant 0 : i32
    %c0_i32_0 = arith.constant 0 : i32
    %c0_i32_1 = arith.constant 0 : i32
    return %c0_i32, %c0_i32_0 : i32, i32
  }
  func.func @transform_6(%arg0: i32) -> (i32, i32) {
    %c0_i32 = arith.constant 0 : i32
    %c0_i32_0 = arith.constant 0 : i32
    %c0_i32_1 = arith.constant 0 : i32
    return %c0_i32, %c0_i32_0 : i32, i32
  }
  func.func @transform_7(%arg0: i32) -> (i32, i32) {
    %c0_i32 = arith.constant 0 : i32
    %c0_i32_0 = arith.constant 0 : i32
    %c0_i32_1 = arith.constant 0 : i32
    return %c0_i32, %c0_i32_0 : i32, i32
  }
  func.func @transform_8(%arg0: i32) -> (i32, i32) {
    %c0_i32 = arith.constant 0 : i32
    %c0_i32_0 = arith.constant 0 : i32
    %c0_i32_1 = arith.constant 0 : i32
    return %c0_i32, %c0_i32_0 : i32, i32
  }
  func.func @transform_9(%arg0: i32) -> (i32, i32) {
    %c0_i32 = arith.constant 0 : i32
    %c0_i32_0 = arith.constant 0 : i32
    %c0_i32_1 = arith.constant 0 : i32
    return %c0_i32, %c0_i32_0 : i32, i32
  }
  func.func @transform_10(%arg0: i32) -> (i32, i32) {
    %c0_i32 = arith.constant 0 : i32
    %c0_i32_0 = arith.constant 0 : i32
    %c0_i32_1 = arith.constant 0 : i32
    return %c0_i32, %c0_i32_0 : i32, i32
  }
  func.func @transform_11(%arg0: i32) -> (i32, i32) {
    %c0_i32 = arith.constant 0 : i32
    %c0_i32_0 = arith.constant 0 : i32
    return %arg0, %c0_i32 : i32, i32
  }
}

</mosaic_0001>

<bundles_post_ra>
// kernel: tpu_custom_call.1
= control target key start
LH: loop header
LB: loop body
LE: loop exit
PB: predicated region body
PF: predicated region fallthrough
CT: control target
= control target key end

     0   :  { %16 = vsyncpa [#allocation3], 0  ;;  %s5282_s0 = inlined_call_operand.hbm [shape: f32[8,256], index: 0, kind: input, shape index: {}]   ;;  %s5283_s1 = inlined_call_operand.hbm [shape: f32[8,128], index: 1, kind: input, shape index: {}]   ;;  %s5284_s2 = inlined_call_operand.hbm [shape: bf16[256,1024], index: 2, kind: input, shape index: {}]   ;;  %s5285_s3 = inlined_call_operand.vmem [shape: f32[1,1024], index: 3, kind: input, shape index: {}]   ;;  %s5286_s4 = inlined_call_operand.hbm [shape: bf16[1024,512], index: 4, kind: input, shape index: {}]   ;;  %s5287_s5 = inlined_call_operand.hbm [shape: bf16[128,512], index: 5, kind: input, shape index: {}]   ;;  %s5288_s6 = inlined_call_operand.vmem [shape: f32[1,512], index: 6, kind: input, shape index: {}]   ;;  %s5289_s7 = inlined_call_operand.hbm [shape: bf16[512,128], index: 7, kind: input, shape index: {}]   ;;  %s5290_s8 = inlined_call_operand.vmem [shape: f32[1,128], index: 8, kind: input, shape index: {}]   ;;  %s5291_s9 = inlined_call_operand.hbm [shape: bf16[128,128], index: 9, kind: input, shape index: {}]   ;;  %s5292_s10 = inlined_call_operand.vmem [shape: f32[1,128], index: 10, kind: input, shape index: {}]   ;;  %s5293_s11 = inlined_call_operand.hbm [shape: f32[8,128], index: 11, kind: output, shape index: {}]  }
   0x1   :  { %17 = vsyncpa [#allocation6], 0 }
   0x2   :  { %18 = vsyncpa [#allocation9], 0 }
   0x3   :  { %19 = vsyncpa [#allocation12], 0 }
   0x4   :  { %20 = vsyncpa [#allocation4], 0  ;;  %s4980_s17 = smov [#allocation5]   ;;  %s4981_s19 = smov [#allocation8]  }
   0x5   :  { %s37_s18 = sshll.u32 %s4980_s17, 4  ;;  %s60_s20 = sshll.u32 %s4981_s19, 4  ;;  %s38_s18 = int_to_ptr.vmem [resolvable:$true] %s37_s18  ;;  %s5057_s20 = int_to_ptr.vmem [resolvable:$true] %s60_s20 }
   0x6   :  { %s4794_s23 = scalar_lea.hbm %s5283_s1, 128 }
   0x7   :  { %p4795_p0 = scmp.ne.s32.totalorder %s5283_s1, %s4794_s23  ;;  %p4798_p1 = scmp.lt.u32.totalorder %s4794_s23, %s5283_s1 }
   0x9   :  { %p4800_p2 = pnand %p4798_p1, %p4795_p0 }
   0xb   :  { %4803 = shalt.err (!%p4800_p2)
}
   0xc   :  { %s4804_s28 = scalar_lea.vmem %s38_s18, 128  ;;  %p4809_p4 = scmp.lt.s32.totalorder %s38_s18, %s38_s18 }
   0xd   :  { %p4805_p3 = scmp.ne.s32.totalorder %s38_s18, %s4804_s28  ;;  %p4810_p5 = scmp.lt.s32.totalorder %s4804_s28, %s4804_s28 }
   0xf   :  { %p4811_p6 = por %p4810_p5, %p4809_p4 }
  0x11   :  { %p4812_p7 = pnand %p4811_p6, %p4805_p3 }
  0x13   :  { %4815 = shalt.err (!%p4812_p7)
}
  0x14   :  { %40 = dma.hbm_to_vmem [thread:$0]  %s5283_s1, 128, %s38_s18, [#allocation6]  }
  0x15   :  { %s4816_s14 = scalar_lea.hbm %s5286_s4, 32768 }
  0x16   :  { %p4817_p8 = scmp.ne.s32.totalorder %s5286_s4, %s4816_s14  ;;  %p4820_p9 = scmp.lt.u32.totalorder %s4816_s14, %s5286_s4 }
  0x18   :  { %p4822_p10 = pnand %p4820_p9, %p4817_p8 }
  0x1a   :  { %4825 = shalt.err (!%p4822_p10)
}
  0x1b   :  { %s4826_s21 = scalar_lea.vmem %s5057_s20, 32768  ;;  %p4831_p12 = scmp.lt.s32.totalorder %s5057_s20, %s5057_s20 }
  0x1c   :  { %p4827_p11 = scmp.ne.s32.totalorder %s5057_s20, %s4826_s21  ;;  %p4832_p13 = scmp.lt.s32.totalorder %s4826_s21, %s4826_s21 }
  0x1e   :  { %p4833_p0 = por %p4832_p13, %p4831_p12 }
  0x20   :  { %p4834_p1 = pnand %p4833_p0, %p4827_p11 }
  0x22   :  { %4837 = shalt.err (!%p4834_p1)
}
  0x23   :  { %s4982_s1 = smov 256   ;;  %s4983_s18 = smov 16  }
  0x24   :  { %66 = dma.hbm_to_vmem [thread:$0]  %s5286_s4, 32768, %s5057_s20, [#allocation9], %s4982_s1, %s4982_s1, %s4983_s18  }
  0x25   :  { %s4984_s24 = smov [#allocation11]   ;;  %s4838_s28 = scalar_lea.hbm %s5289_s7, 4096 }
  0x26   :  { %s86_s25 = sshll.u32 %s4984_s24, 4  ;;  %p4839_p2 = scmp.ne.s32.totalorder %s5289_s7, %s4838_s28  ;;  %s87_s25 = int_to_ptr.vmem [resolvable:$true] %s86_s25 }
  0x27   :  { %p4842_p3 = scmp.lt.u32.totalorder %s4838_s28, %s5289_s7 }
  0x29   :  { %p4844_p4 = pnand %p4842_p3, %p4839_p2 }
  0x2b   :  { %4847 = shalt.err (!%p4844_p4)
}
  0x2c   :  { %s4848_s14 = scalar_lea.vmem %s87_s25, 4096  ;;  %p4853_p6 = scmp.lt.s32.totalorder %s87_s25, %s87_s25 }
  0x2d   :  { %p4849_p5 = scmp.ne.s32.totalorder %s87_s25, %s4848_s14  ;;  %p4854_p7 = scmp.lt.s32.totalorder %s4848_s14, %s4848_s14 }
  0x2f   :  { %p4855_p8 = por %p4854_p7, %p4853_p6 }
  0x31   :  { %p4856_p9 = pnand %p4855_p8, %p4849_p5 }
  0x33   :  { %4859 = shalt.err (!%p4856_p9)
}
  0x34   :  { %s4985_s4 = smov 64   ;;  %s4986_s20 = smov 4  }
  0x35   :  { %92 = dma.hbm_to_vmem [thread:$0]  %s5289_s7, 4096, %s87_s25, [#allocation12], %s4985_s4, %s4985_s4, %s4986_s20  }
  0x36   :  { %s4987_s17 = smov [#allocation2]   ;;  %s4988_s21 = smov [#allocation7]  }
  0x37   :  { %s27_s19 = sshll.u32 %s4987_s17, 4  ;;  %s46_s22 = sshll.u32 %s4988_s21, 4  ;;  %s28_s19 = int_to_ptr.vmem [resolvable:$true] %s27_s19  ;;  %s47_s22 = int_to_ptr.vmem [resolvable:$true] %s46_s22 }
  0x38   :  { %s4860_s26 = scalar_lea.hbm %s5282_s0, 256 }
  0x39   :  { %p4861_p10 = scmp.ne.s32.totalorder %s5282_s0, %s4860_s26  ;;  %p4864_p11 = scmp.lt.u32.totalorder %s4860_s26, %s5282_s0 }
  0x3b   :  { %p4866_p12 = pnand %p4864_p11, %p4861_p10 }
  0x3d   :  { %4869 = shalt.err (!%p4866_p12)
}
  0x3e   :  { %s4870_s7 = scalar_lea.vmem %s28_s19, 256  ;;  %p4875_p0 = scmp.lt.s32.totalorder %s28_s19, %s28_s19 }
  0x3f   :  { %p4871_p13 = scmp.ne.s32.totalorder %s28_s19, %s4870_s7  ;;  %p4876_p1 = scmp.lt.s32.totalorder %s4870_s7, %s4870_s7 }
  0x41   :  { %p4877_p2 = por %p4876_p1, %p4875_p0 }
  0x43   :  { %p4878_p3 = pnand %p4877_p2, %p4871_p13 }
  0x45   :  { %4881 = shalt.err (!%p4878_p3)
}
  0x46   :  { %30 = dma.hbm_to_vmem [thread:$0]  %s5282_s0, 256, %s28_s19, [#allocation3]  }
  0x47   :  { %s4882_s15 = scalar_lea.hbm %s5284_s2, 16384 }
  0x48   :  { %p4883_p4 = scmp.ne.s32.totalorder %s5284_s2, %s4882_s15  ;;  %p4886_p5 = scmp.lt.u32.totalorder %s4882_s15, %s5284_s2 }
  0x4a   :  { %p4888_p6 = pnand %p4886_p5, %p4883_p4 }
  0x4c   :  { %4891 = shalt.err (!%p4888_p6)
}
  0x4d   :  { %s4892_s24 = scalar_lea.vmem %s47_s22, 16384  ;;  %p4897_p8 = scmp.lt.s32.totalorder %s47_s22, %s47_s22 }
  0x4e   :  { %p4893_p7 = scmp.ne.s32.totalorder %s47_s22, %s4892_s24  ;;  %p4898_p9 = scmp.lt.s32.totalorder %s4892_s24, %s4892_s24 }
  0x50   :  { %p4899_p10 = por %p4898_p9, %p4897_p8 }
  0x52   :  { %p4900_p11 = pnand %p4899_p10, %p4893_p7 }
  0x54   :  { %4903 = shalt.err (!%p4900_p11)
}
  0x55   :  { %s4989_s0 = smov 512   ;;  %s4990_s19 = smov 32  }
  0x56   :  { %52 = dma.hbm_to_vmem [thread:$0]  %s5284_s2, 16384, %s47_s22, [#allocation6], %s4989_s0, %s4989_s0, %s4990_s19  }
  0x57   :  { %s4991_s28 = smov [#allocation10]   ;;  %s4992_s30 = smov [#allocation13]  }
  0x58   :  { %s72_s29 = sshll.u32 %s4991_s28, 4  ;;  %s100_s7 = sshll.u32 %s4992_s30, 4  ;;  %s73_s29 = int_to_ptr.vmem [resolvable:$true] %s72_s29  ;;  %s101_s7 = int_to_ptr.vmem [resolvable:$true] %s100_s7 }
  0x59   :  { %s4904_s13 = scalar_lea.hbm %s5287_s5, 4096 }
  0x5a   :  { %p4905_p12 = scmp.ne.s32.totalorder %s5287_s5, %s4904_s13  ;;  %p4908_p13 = scmp.lt.u32.totalorder %s4904_s13, %s5287_s5 }
  0x5c   :  { %p4910_p0 = pnand %p4908_p13, %p4905_p12 }
  0x5e   :  { %4913 = shalt.err (!%p4910_p0)
}
  0x5f   :  { %s4914_s2 = scalar_lea.vmem %s73_s29, 4096  ;;  %p4919_p2 = scmp.lt.s32.totalorder %s73_s29, %s73_s29 }
  0x60   :  { %p4915_p1 = scmp.ne.s32.totalorder %s73_s29, %s4914_s2  ;;  %p4920_p3 = scmp.lt.s32.totalorder %s4914_s2, %s4914_s2 }
  0x62   :  { %p4921_p4 = por %p4920_p3, %p4919_p2 }
  0x64   :  { %p4922_p5 = pnand %p4921_p4, %p4915_p1 }
  0x66   :  { %4925 = shalt.err (!%p4922_p5)
}
  0x67   :  { %78 = dma.hbm_to_vmem [thread:$0]  %s5287_s5, 4096, %s73_s29, [#allocation9], %s4982_s1, %s4982_s1, %s4983_s18  }
  0x68   :  { %s4926_s0 = scalar_lea.hbm %s5291_s9, 1024 }
  0x69   :  { %p4927_p6 = scmp.ne.s32.totalorder %s5291_s9, %s4926_s0  ;;  %p4930_p7 = scmp.lt.u32.totalorder %s4926_s0, %s5291_s9 }
  0x6b   :  { %p4932_p8 = pnand %p4930_p7, %p4927_p6 }
  0x6d   :  { %4935 = shalt.err (!%p4932_p8)
}
  0x6e   :  { %s4936_s30 = scalar_lea.vmem %s101_s7, 1024  ;;  %p4941_p10 = scmp.lt.s32.totalorder %s101_s7, %s101_s7 }
  0x6f   :  { %p4937_p9 = scmp.ne.s32.totalorder %s101_s7, %s4936_s30  ;;  %p4942_p11 = scmp.lt.s32.totalorder %s4936_s30, %s4936_s30 }
  0x71   :  { %p4943_p12 = por %p4942_p11, %p4941_p10 }
  0x73   :  { %p4944_p13 = pnand %p4943_p12, %p4937_p9 }
  0x75   :  { %4947 = shalt.err (!%p4944_p13)
}
  0x76   :  { %106 = dma.hbm_to_vmem [thread:$0]  %s5291_s9, 1024, %s101_s7, [#allocation12], %s4985_s4, %s4985_s4, %s4986_s20  }
  0x77   :  { %4970 = dma.done.wait [#allocation3], 256  }
  0x78   :  { %4971 = vsyncadd [#allocation3], 4294967040 }
  0x79   :  { %4972 = dma.done.wait [#allocation6], 16512  }
  0x7a   :  { %4973 = vsyncadd [#allocation6], 4294950784 }
  0x7b   :  { %4974 = dma.done.wait [#allocation9], 36864  }
  0x7c   :  { %4975 = vsyncadd [#allocation9], 4294930432 }
  0x7d   :  { %4976 = dma.done.wait [#allocation12], 5120  }
  0x7e   :  { %4977 = vsyncadd [#allocation12], 4294962176  ;;  %v135_v0 = vld [vmem:[#allocation7] sm:$0xff]  ;;  %v136_v2 = vld [vmem:[#allocation7 + $0x8] sm:$0xff]  ;;  %vm4995_vm0 = vmmov 0   ;;  %s4996_s25 = smov [#allocation14]  }
  0x7f   :  { %v139_v1 = vld [vmem:[#allocation7 + $0x20] sm:$0xff]  ;;  %v140_v4 = vld [vmem:[#allocation7 + $0x28] sm:$0xff]  ;;  %v132_v53 = vld [vmem:[#allocation2 + $0x8] sm:$0xff]  ;;  %s3762_s12 = sshll.u32 %s4996_s25, 4  ;;  %s3763_s12 = int_to_ptr.vmem [resolvable:$true] %s3762_s12 }
  0x80   :  { %v3775_v3 = vcombine.high %v135_v0, %v139_v1  ;;  %v3774_v5 = vcombine.low %v135_v0, %v139_v1  ;;  %v143_v6 = vld [vmem:[#allocation7 + $0x40] sm:$0xff]  ;;  %v3777_v8 = vcombine.high %v136_v2, %v140_v4  ;;  %v3776_v9 = vcombine.low %v136_v2, %v140_v4  ;;  %v144_v11 = vld [vmem:[#allocation7 + $0x48] sm:$0xff]  ;;  %p4953_p1 = scmp.lt.s32.totalorder %s3763_s12, %s3763_s12 }
  0x81   :  { %v147_v7 = vld [vmem:[#allocation7 + $0x60] sm:$0xff]  ;;  %v148_v12 = vld [vmem:[#allocation7 + $0x68] sm:$0xff]  ;;  %v5160_v57 = vpack.c.bf16 %v132_v53, %v132_v53 }
  0x82   :  { %v3783_v10 = vcombine.high %v143_v6, %v147_v7  ;;  %v151_v13 = vld [vmem:[#allocation7 + $0x80] sm:$0xff]  ;;  %945 = vmatprep.subr.bf16.mxu0 %v3775_v3  ;;  %v3785_v14 = vcombine.high %v144_v11, %v148_v12  ;;  %v152_v16 = vld [vmem:[#allocation7 + $0x88] sm:$0xff]  ;;  %986 = vmatprep.subr.bf16.mxu1 %v3777_v8  ;;  %v3782_v18 = vcombine.low %v143_v6, %v147_v7 }
  0x83   :  { %v155_v15 = vld [vmem:[#allocation7 + $0xa0] sm:$0xff]  ;;  %v156_v17 = vld [vmem:[#allocation7 + $0xa8] sm:$0xff]  ;;  %946 = vmatpush1.bf16.msra.mxu0 %v3774_v5  ;;  %987 = vmatpush1.bf16.msra.mxu1 %v3776_v9  ;;  %v3784_v19 = vcombine.low %v144_v11, %v148_v12 }
  0x84   :  { %947 = vmatprep.subr.bf16.mxu0 %v3783_v10  ;;  %v3791_v20 = vcombine.high %v151_v13, %v155_v15  ;;  %988 = vmatprep.subr.bf16.mxu1 %v3785_v14  ;;  %v3793_v21 = vcombine.high %v152_v16, %v156_v17  ;;  %v159_v22 = vld [vmem:[#allocation7 + $0xc0] sm:$0xff]  ;;  %v160_v24 = vld [vmem:[#allocation7 + $0xc8] sm:$0xff]  ;;  %v3790_v26 = vcombine.low %v151_v13, %v155_v15 }
  0x85   :  { %v163_v23 = vld [vmem:[#allocation7 + $0xe0] sm:$0xff]  ;;  %v164_v25 = vld [vmem:[#allocation7 + $0xe8] sm:$0xff]  ;;  %v3792_v27 = vcombine.low %v152_v16, %v156_v17  ;;  %977 = vmatprep.mubr.bf16.mxu0 %v5160_v57  ;;  %1018 = vmatprep.mubr.bf16.mxu1 %v5160_v57 }
  0x86   :  { %v3799_v28 = vcombine.high %v159_v22, %v163_v23  ;;  %v3801_v29 = vcombine.high %v160_v24, %v164_v25  ;;  %v167_v30 = vld [vmem:[#allocation7 + $0x100] sm:$0xff]  ;;  %v168_v32 = vld [vmem:[#allocation7 + $0x108] sm:$0xff]  ;;  %v3798_v34 = vcombine.low %v159_v22, %v163_v23  ;;  %v3800_v35 = vcombine.low %v160_v24, %v164_v25 }
  0x87   :  { %948 = vmatpush1.bf16.msra.mxu0 %v3782_v18  ;;  %989 = vmatpush1.bf16.msra.mxu1 %v3784_v19  ;;  %v171_v31 = vld [vmem:[#allocation7 + $0x120] sm:$0xff]  ;;  %v172_v33 = vld [vmem:[#allocation7 + $0x128] sm:$0xff] }
  0x88   :  { %949 = vmatprep.subr.bf16.mxu0 %v3791_v20  ;;  %990 = vmatprep.subr.bf16.mxu1 %v3793_v21  ;;  %v3807_v36 = vcombine.high %v167_v30, %v171_v31  ;;  %v3809_v37 = vcombine.high %v168_v32, %v172_v33  ;;  %v175_v38 = vld [vmem:[#allocation7 + $0x140] sm:$0xff]  ;;  %v176_v40 = vld [vmem:[#allocation7 + $0x148] sm:$0xff]  ;;  %v3806_v42 = vcombine.low %v167_v30, %v171_v31 }
  0x89   :  { %v179_v39 = vld [vmem:[#allocation7 + $0x160] sm:$0xff]  ;;  %v180_v41 = vld [vmem:[#allocation7 + $0x168] sm:$0xff]  ;;  %v3808_v43 = vcombine.low %v168_v32, %v172_v33 }
  0x8a   :  { %v3815_v44 = vcombine.high %v175_v38, %v179_v39  ;;  %v3817_v45 = vcombine.high %v176_v40, %v180_v41  ;;  %v183_v46 = vld [vmem:[#allocation7 + $0x180] sm:$0xff]  ;;  %v184_v48 = vld [vmem:[#allocation7 + $0x188] sm:$0xff]  ;;  %v3814_v50 = vcombine.low %v175_v38, %v179_v39  ;;  %v3816_v51 = vcombine.low %v176_v40, %v180_v41 }
  0x8b   :  { %950 = vmatpush1.bf16.msra.mxu0 %v3790_v26  ;;  %991 = vmatpush1.bf16.msra.mxu1 %v3792_v27  ;;  %v187_v47 = vld [vmem:[#allocation7 + $0x1a0] sm:$0xff]  ;;  %v188_v49 = vld [vmem:[#allocation7 + $0x1a8] sm:$0xff] }
  0x8c   :  { %951 = vmatprep.subr.bf16.mxu0 %v3799_v28  ;;  %992 = vmatprep.subr.bf16.mxu1 %v3801_v29  ;;  %v3823_v52 = vcombine.high %v183_v46, %v187_v47  ;;  %v3825_v54 = vcombine.high %v184_v48, %v188_v49  ;;  %v191_v55 = vld [vmem:[#allocation7 + $0x1c0] sm:$0xff]  ;;  %v192_v58 = vld [vmem:[#allocation7 + $0x1c8] sm:$0xff]  ;;  %v3822_v60 = vcombine.low %v183_v46, %v187_v47 }
  0x8d   :  { %v195_v56 = vld [vmem:[#allocation7 + $0x1e0] sm:$0xff]  ;;  %v196_v59 = vld [vmem:[#allocation7 + $0x1e8] sm:$0xff]  ;;  %v3824_v61 = vcombine.low %v184_v48, %v188_v49 }
  0x8e   :  { %v3831_v62 = vcombine.high %v191_v55, %v195_v56  ;;  %v3833_v63 = vcombine.high %v192_v58, %v196_v59  ;;  %v199_v0 = vld [vmem:[#allocation7 + $0x200] sm:$0xff]  ;;  %v200_v2 = vld [vmem:[#allocation7 + $0x208] sm:$0xff]  ;;  %v3830_v4 = vcombine.low %v191_v55, %v195_v56  ;;  %v3832_v5 = vcombine.low %v192_v58, %v196_v59 }
  0x8f   :  { %952 = vmatpush1.bf16.msra.mxu0 %v3798_v34  ;;  %993 = vmatpush1.bf16.msra.mxu1 %v3800_v35  ;;  %v203_v1 = vld [vmem:[#allocation7 + $0x220] sm:$0xff]  ;;  %v204_v3 = vld [vmem:[#allocation7 + $0x228] sm:$0xff] }
  0x90   :  { %953 = vmatprep.subr.bf16.mxu0 %v3807_v36  ;;  %994 = vmatprep.subr.bf16.mxu1 %v3809_v37  ;;  %v3839_v6 = vcombine.high %v199_v0, %v203_v1  ;;  %v3841_v7 = vcombine.high %v200_v2, %v204_v3  ;;  %v207_v8 = vld [vmem:[#allocation7 + $0x240] sm:$0xff]  ;;  %v208_v10 = vld [vmem:[#allocation7 + $0x248] sm:$0xff]  ;;  %v3838_v12 = vcombine.low %v199_v0, %v203_v1  ;;  %v137_v0 = vld [vmem:[#allocation7 + $0x10] sm:$0xff] }
  0x91   :  { %v211_v9 = vld [vmem:[#allocation7 + $0x260] sm:$0xff]  ;;  %v212_v11 = vld [vmem:[#allocation7 + $0x268] sm:$0xff]  ;;  %v3840_v13 = vcombine.low %v200_v2, %v204_v3  ;;  %v141_v1 = vld [vmem:[#allocation7 + $0x30] sm:$0xff] }
  0x92   :  { %v3847_v14 = vcombine.high %v207_v8, %v211_v9  ;;  %v3849_v15 = vcombine.high %v208_v10, %v212_v11  ;;  %v215_v16 = vld [vmem:[#allocation7 + $0x280] sm:$0xff]  ;;  %v216_v18 = vld [vmem:[#allocation7 + $0x288] sm:$0xff]  ;;  %v3846_v20 = vcombine.low %v207_v8, %v211_v9  ;;  %v3848_v21 = vcombine.low %v208_v10, %v212_v11  ;;  %v138_v3 = vld [vmem:[#allocation7 + $0x18] sm:$0xff] }
  0x93   :  { %954 = vmatpush1.bf16.msra.mxu0 %v3806_v42  ;;  %995 = vmatpush1.bf16.msra.mxu1 %v3808_v43  ;;  %v219_v17 = vld [vmem:[#allocation7 + $0x2a0] sm:$0xff]  ;;  %v220_v19 = vld [vmem:[#allocation7 + $0x2a8] sm:$0xff]  ;;  %v3779_v8 = vcombine.high %v137_v0, %v141_v1  ;;  %v145_v9 = vld [vmem:[#allocation7 + $0x50] sm:$0xff] }
  0x94   :  { %955 = vmatprep.subr.bf16.mxu0 %v3815_v44  ;;  %996 = vmatprep.subr.bf16.mxu1 %v3817_v45  ;;  %v3855_v22 = vcombine.high %v215_v16, %v219_v17  ;;  %v3857_v23 = vcombine.high %v216_v18, %v220_v19  ;;  %v223_v24 = vld [vmem:[#allocation7 + $0x2c0] sm:$0xff]  ;;  %v224_v26 = vld [vmem:[#allocation7 + $0x2c8] sm:$0xff]  ;;  %v3854_v28 = vcombine.low %v215_v16, %v219_v17  ;;  %v149_v10 = vld [vmem:[#allocation7 + $0x70] sm:$0xff] }
  0x95   :  { %v227_v25 = vld [vmem:[#allocation7 + $0x2e0] sm:$0xff]  ;;  %v228_v27 = vld [vmem:[#allocation7 + $0x2e8] sm:$0xff]  ;;  %v3856_v29 = vcombine.low %v216_v18, %v220_v19  ;;  %v3787_v17 = vcombine.high %v145_v9, %v149_v10  ;;  %v153_v18 = vld [vmem:[#allocation7 + $0x90] sm:$0xff] }
  0x96   :  { %v3863_v30 = vcombine.high %v223_v24, %v227_v25  ;;  %v3865_v31 = vcombine.high %v224_v26, %v228_v27  ;;  %v231_v32 = vld [vmem:[#allocation7 + $0x300] sm:$0xff]  ;;  %v232_v34 = vld [vmem:[#allocation7 + $0x308] sm:$0xff]  ;;  %v3862_v36 = vcombine.low %v223_v24, %v227_v25  ;;  %v3864_v37 = vcombine.low %v224_v26, %v228_v27  ;;  %v161_v26 = vld [vmem:[#allocation7 + $0xd0] sm:$0xff] }
  0x97   :  { %956 = vmatpush1.bf16.msra.mxu0 %v3814_v50  ;;  %997 = vmatpush1.bf16.msra.mxu1 %v3816_v51  ;;  %v235_v33 = vld [vmem:[#allocation7 + $0x320] sm:$0xff]  ;;  %v236_v35 = vld [vmem:[#allocation7 + $0x328] sm:$0xff] }
  0x98   :  { %957 = vmatprep.subr.bf16.mxu0 %v3823_v52  ;;  %998 = vmatprep.subr.bf16.mxu1 %v3825_v54  ;;  %v3871_v38 = vcombine.high %v231_v32, %v235_v33  ;;  %v239_v39 = vld [vmem:[#allocation7 + $0x340] sm:$0xff]  ;;  %v3873_v41 = vcombine.high %v232_v34, %v236_v35  ;;  %v240_v42 = vld [vmem:[#allocation7 + $0x348] sm:$0xff]  ;;  %v3870_v44 = vcombine.low %v231_v32, %v235_v33 }
  0x99   :  { %v243_v40 = vld [vmem:[#allocation7 + $0x360] sm:$0xff]  ;;  %v244_v43 = vld [vmem:[#allocation7 + $0x368] sm:$0xff]  ;;  %v3872_v45 = vcombine.low %v232_v34, %v236_v35  ;;  %v169_v34 = vld [vmem:[#allocation7 + $0x110] sm:$0xff] }
  0x9a   :  { %v3879_v46 = vcombine.high %v239_v39, %v243_v40  ;;  %v247_v47 = vld [vmem:[#allocation7 + $0x380] sm:$0xff]  ;;  %v3881_v49 = vcombine.high %v240_v42, %v244_v43  ;;  %v248_v50 = vld [vmem:[#allocation7 + $0x388] sm:$0xff]  ;;  %v3878_v52 = vcombine.low %v239_v39, %v243_v40  ;;  %v3880_v53 = vcombine.low %v240_v42, %v244_v43  ;;  %v177_v42 = vld [vmem:[#allocation7 + $0x150] sm:$0xff] }
  0x9b   :  { %958 = vmatpush1.bf16.msra.mxu0 %v3822_v60  ;;  %999 = vmatpush1.bf16.msra.mxu1 %v3824_v61  ;;  %v251_v48 = vld [vmem:[#allocation7 + $0x3a0] sm:$0xff]  ;;  %v252_v51 = vld [vmem:[#allocation7 + $0x3a8] sm:$0xff]  ;;  %v181_v43 = vld [vmem:[#allocation7 + $0x170] sm:$0xff] }
  0x9c   :  { %959 = vmatprep.subr.bf16.mxu0 %v3831_v62  ;;  %1000 = vmatprep.subr.bf16.mxu1 %v3833_v63  ;;  %v3887_v54 = vcombine.high %v247_v47, %v251_v48  ;;  %v255_v55 = vld [vmem:[#allocation7 + $0x3c0] sm:$0xff]  ;;  %v3889_v58 = vcombine.high %v248_v50, %v252_v51  ;;  %v256_v59 = vld [vmem:[#allocation7 + $0x3c8] sm:$0xff]  ;;  %v3886_v61 = vcombine.low %v247_v47, %v251_v48 }
  0x9d   :  { %v259_v56 = vld [vmem:[#allocation7 + $0x3e0] sm:$0xff]  ;;  %v260_v60 = vld [vmem:[#allocation7 + $0x3e8] sm:$0xff]  ;;  %v3888_v62 = vcombine.low %v248_v50, %v252_v51  ;;  %v3819_v48 = vcombine.high %v177_v42, %v181_v43  ;;  %v189_v51 = vld [vmem:[#allocation7 + $0x1b0] sm:$0xff] }
  0x9e   :  { %v3895_v63 = vcombine.high %v255_v55, %v259_v56  ;;  %v3897_v2 = vcombine.high %v256_v59, %v260_v60 }
  0x9f   :  { %960 = vmatpush1.bf16.msra.mxu0 %v3830_v4  ;;  %1001 = vmatpush1.bf16.msra.mxu1 %v3832_v5  ;;  %v142_v4 = vld [vmem:[#allocation7 + $0x38] sm:$0xff]  ;;  %v3894_v5 = vcombine.low %v255_v55, %v259_v56 }
  0xa0   :  { %961 = vmatprep.subr.bf16.mxu0 %v3839_v6  ;;  %1002 = vmatprep.subr.bf16.mxu1 %v3841_v7  ;;  %v131_v6 = vld [vmem:[#allocation2] sm:$0xff]  ;;  %v3896_v7 = vcombine.low %v256_v59, %v260_v60  ;;  %v3781_v11 = vcombine.high %v138_v3, %v142_v4  ;;  %v3780_v16 = vcombine.low %v138_v3, %v142_v4  ;;  %v197_v60 = vld [vmem:[#allocation7 + $0x1f0] sm:$0xff] }
  0xa1   :  { %v205_v4 = vld [vmem:[#allocation7 + $0x230] sm:$0xff] }
  0xa3   :  { %962 = vmatpush1.bf16.msra.mxu0 %v3838_v12  ;;  %1003 = vmatpush1.bf16.msra.mxu1 %v3840_v13  ;;  %v146_v12 = vld [vmem:[#allocation7 + $0x58] sm:$0xff]  ;;  %v5164_v13 = vpack.c.bf16 %v131_v6, %v131_v6 }
  0xa4   :  { %963 = vmatprep.subr.bf16.mxu0 %v3847_v14  ;;  %1004 = vmatprep.subr.bf16.mxu1 %v3849_v15  ;;  %v150_v14 = vld [vmem:[#allocation7 + $0x78] sm:$0xff]  ;;  %v3778_v15 = vcombine.low %v137_v0, %v141_v1 }
  0xa5   :  { %v3789_v19 = vcombine.high %v146_v12, %v150_v14  ;;  %v3788_v24 = vcombine.low %v146_v12, %v150_v14  ;;  %v206_v6 = vld [vmem:[#allocation7 + $0x238] sm:$0xff]  ;;  %v213_v12 = vld [vmem:[#allocation7 + $0x270] sm:$0xff] }
  0xa6   :  { %v210_v14 = vld [vmem:[#allocation7 + $0x258] sm:$0xff] }
  0xa7   :  { %964 = vmatpush1.bf16.msra.mxu0 %v3846_v20  ;;  %1005 = vmatpush1.bf16.msra.mxu1 %v3848_v21  ;;  %v157_v20 = vld [vmem:[#allocation7 + $0xb0] sm:$0xff]  ;;  %v154_v21 = vld [vmem:[#allocation7 + $0x98] sm:$0xff] }
  0xa8   :  { %965 = vmatprep.subr.bf16.mxu0 %v3855_v22  ;;  %1006 = vmatprep.subr.bf16.mxu1 %v3857_v23  ;;  %v158_v22 = vld [vmem:[#allocation7 + $0xb8] sm:$0xff]  ;;  %v3786_v23 = vcombine.low %v145_v9, %v149_v10  ;;  %v3795_v25 = vcombine.high %v153_v18, %v157_v20  ;;  %v209_v10 = vld [vmem:[#allocation7 + $0x250] sm:$0xff] }
  0xa9   :  { %v3797_v27 = vcombine.high %v154_v21, %v158_v22  ;;  %v3796_v32 = vcombine.low %v154_v21, %v158_v22  ;;  %v221_v21 = vld [vmem:[#allocation7 + $0x2b0] sm:$0xff]  ;;  %v218_v22 = vld [vmem:[#allocation7 + $0x298] sm:$0xff] }
  0xab   :  { %966 = vmatpush1.bf16.msra.mxu0 %v3854_v28  ;;  %1007 = vmatpush1.bf16.msra.mxu1 %v3856_v29  ;;  %v165_v28 = vld [vmem:[#allocation7 + $0xf0] sm:$0xff]  ;;  %v162_v29 = vld [vmem:[#allocation7 + $0xd8] sm:$0xff] }
  0xac   :  { %967 = vmatprep.subr.bf16.mxu0 %v3863_v30  ;;  %1008 = vmatprep.subr.bf16.mxu1 %v3865_v31  ;;  %v166_v30 = vld [vmem:[#allocation7 + $0xf8] sm:$0xff]  ;;  %v3794_v31 = vcombine.low %v153_v18, %v157_v20  ;;  %v3803_v33 = vcombine.high %v161_v26, %v165_v28  ;;  %v3802_v39 = vcombine.low %v161_v26, %v165_v28  ;;  %v229_v28 = vld [vmem:[#allocation7 + $0x2f0] sm:$0xff] }
  0xad   :  { %v3805_v35 = vcombine.high %v162_v29, %v166_v30  ;;  %v3804_v40 = vcombine.low %v162_v29, %v166_v30  ;;  %v3851_v18 = vcombine.high %v209_v10, %v213_v12  ;;  %v226_v30 = vld [vmem:[#allocation7 + $0x2d8] sm:$0xff] }
  0xaf   :  { %968 = vmatpush1.bf16.msra.mxu0 %v3862_v36  ;;  %1009 = vmatpush1.bf16.msra.mxu1 %v3864_v37  ;;  %v173_v36 = vld [vmem:[#allocation7 + $0x130] sm:$0xff]  ;;  %v170_v37 = vld [vmem:[#allocation7 + $0x118] sm:$0xff] }
  0xb0   :  { %969 = vmatprep.subr.bf16.mxu0 %v3871_v38  ;;  %1010 = vmatprep.subr.bf16.mxu1 %v3873_v41  ;;  %v174_v38 = vld [vmem:[#allocation7 + $0x138] sm:$0xff]  ;;  %v3811_v41 = vcombine.high %v169_v34, %v173_v36 }
  0xb1   :  { %v3812_v47 = vcombine.low %v170_v37, %v174_v38 }
  0xb3   :  { %970 = vmatpush1.bf16.msra.mxu0 %v3870_v44  ;;  %1011 = vmatpush1.bf16.msra.mxu1 %v3872_v45  ;;  %v178_v44 = vld [vmem:[#allocation7 + $0x158] sm:$0xff] }
  0xb4   :  { %971 = vmatprep.subr.bf16.mxu0 %v3879_v46  ;;  %1012 = vmatprep.subr.bf16.mxu1 %v3881_v49  ;;  %v182_v45 = vld [vmem:[#allocation7 + $0x178] sm:$0xff]  ;;  %v3810_v46 = vcombine.low %v169_v34, %v173_v36  ;;  %v185_v49 = vld [vmem:[#allocation7 + $0x190] sm:$0xff] }
  0xb5   :  { %v3821_v50 = vcombine.high %v178_v44, %v182_v45  ;;  %v3820_v55 = vcombine.low %v178_v44, %v182_v45  ;;  %v3827_v56 = vcombine.high %v185_v49, %v189_v51  ;;  %v237_v34 = vld [vmem:[#allocation7 + $0x330] sm:$0xff]  ;;  %v242_v44 = vld [vmem:[#allocation7 + $0x358] sm:$0xff] }
  0xb6   :  { %v246_v45 = vld [vmem:[#allocation7 + $0x378] sm:$0xff] }
  0xb7   :  { %972 = vmatpush1.bf16.msra.mxu0 %v3878_v52  ;;  %1013 = vmatpush1.bf16.msra.mxu1 %v3880_v53  ;;  %v186_v52 = vld [vmem:[#allocation7 + $0x198] sm:$0xff] }
  0xb8   :  { %973 = vmatprep.subr.bf16.mxu0 %v3887_v54  ;;  %1014 = vmatprep.subr.bf16.mxu1 %v3889_v58  ;;  %v190_v53 = vld [vmem:[#allocation7 + $0x1b8] sm:$0xff]  ;;  %v3818_v54 = vcombine.low %v177_v42, %v181_v43  ;;  %v193_v58 = vld [vmem:[#allocation7 + $0x1d0] sm:$0xff] }
  0xb9   :  { %v3829_v59 = vcombine.high %v186_v52, %v190_v53  ;;  %v3828_v0 = vcombine.low %v186_v52, %v190_v53  ;;  %v3835_v1 = vcombine.high %v193_v58, %v197_v60  ;;  %v245_v42 = vld [vmem:[#allocation7 + $0x370] sm:$0xff]  ;;  %v250_v52 = vld [vmem:[#allocation7 + $0x398] sm:$0xff] }
  0xba   :  { %v254_v53 = vld [vmem:[#allocation7 + $0x3b8] sm:$0xff] }
  0xbb   :  { %974 = vmatpush1.bf16.msra.mxu0 %v3886_v61  ;;  %1015 = vmatpush1.bf16.msra.mxu1 %v3888_v62  ;;  %v194_v61 = vld [vmem:[#allocation7 + $0x1d8] sm:$0xff] }
  0xbc   :  { %975 = vmatprep.subr.bf16.mxu0 %v3895_v63  ;;  %1016 = vmatprep.subr.bf16.mxu1 %v3897_v2  ;;  %v198_v62 = vld [vmem:[#allocation7 + $0x1f8] sm:$0xff]  ;;  %v3826_v63 = vcombine.low %v185_v49, %v189_v51  ;;  %v201_v2 = vld [vmem:[#allocation7 + $0x210] sm:$0xff] }
  0xbd   :  { %v3837_v3 = vcombine.high %v194_v61, %v198_v62  ;;  %v3843_v9 = vcombine.high %v201_v2, %v205_v4  ;;  %v253_v49 = vld [vmem:[#allocation7 + $0x3b0] sm:$0xff] }
  0xbf   :  { %976 = vmatpush1.bf16.msra.mxu0 %v3894_v5  ;;  %1017 = vmatpush1.bf16.msra.mxu1 %v3896_v7  ;;  %v202_v5 = vld [vmem:[#allocation7 + $0x218] sm:$0xff]  ;;  %v3834_v7 = vcombine.low %v193_v58, %v197_v60  ;;  %v261_v58 = vld [vmem:[#allocation7 + $0x3f0] sm:$0xff] }
  0xc0   :  { %1027 = vmatprep.subr.bf16.mxu0 %v3779_v8  ;;  %1068 = vmatprep.subr.bf16.mxu1 %v3781_v11  ;;  %v3836_v8 = vcombine.low %v194_v61, %v198_v62  ;;  %v3845_v11 = vcombine.high %v202_v5, %v206_v6  ;;  %v258_v61 = vld [vmem:[#allocation7 + $0x3d8] sm:$0xff] }
  0xc1   :  { %v262_v62 = vld [vmem:[#allocation7 + $0x3f8] sm:$0xff] }
  0xc2   :  { %978 = vmatmul.mubr.bf16.vlgmr.msra.gmra.mrb[0].mxu0 %v5164_v13  ;;  %1019 = vmatmul.mubr.bf16.vlgmr.msra.gmra.mrb[0].mxu1 %v5164_v13 }
  0xc3   :  { %1028 = vmatpush1.bf16.msra.mxu0 %v3778_v15  ;;  %1069 = vmatpush1.bf16.msra.mxu1 %v3780_v16  ;;  %v214_v15 = vld [vmem:[#allocation7 + $0x278] sm:$0xff]  ;;  %v3842_v16 = vcombine.low %v201_v2, %v205_v4  ;;  %v4324_v4 = vld [vmem:[#allocation10 + $0x4] ss:$16 sps:$4 sm:$0xff]  }
  0xc4   :  { %1029 = vmatprep.subr.bf16.mxu0 %v3787_v17  ;;  %1070 = vmatprep.subr.bf16.mxu1 %v3789_v19  ;;  %v3844_v17 = vcombine.low %v202_v5, %v206_v6  ;;  %v217_v19 = vld [vmem:[#allocation7 + $0x290] sm:$0xff]  ;;  %v3853_v20 = vcombine.high %v210_v14, %v214_v15  ;;  %v3852_v26 = vcombine.low %v210_v14, %v214_v15  ;;  %v4327_v6 = vld [vmem:[#allocation10 + $0xc] ss:$16 sps:$4 sm:$0xff]   ;;  %v4331_v14 = vld [vmem:[#allocation10 + $0x28] ss:$16 sps:$4 sm:$0xff]  }
  0xc5   :  { %1059 = vmatprep.mubr.bf16.mxu0 %v5160_v57  ;;  %1100 = vmatprep.mubr.bf16.mxu1 %v5160_v57  ;;  %v3813_v57 = vcombine.high %v170_v37, %v174_v38  ;;  %v234_v37 = vld [vmem:[#allocation7 + $0x318] sm:$0xff]  ;;  %v4336_v15 = vld [vmem:[#allocation10 + $0x44] ss:$16 sps:$4 sm:$0xff]  }
  0xc6   :  { %v238_v38 = vld [vmem:[#allocation7 + $0x338] sm:$0xff] }
  0xc7   :  { %1030 = vmatpush1.bf16.msra.mxu0 %v3786_v23  ;;  %1071 = vmatpush1.bf16.msra.mxu1 %v3788_v24  ;;  %v222_v23 = vld [vmem:[#allocation7 + $0x2b8] sm:$0xff]  ;;  %v3850_v24 = vcombine.low %v209_v10, %v213_v12  ;;  %v4330_v10 = vld [vmem:[#allocation10 + $0x24] ss:$16 sps:$4 sm:$0xff]   ;;  %v4328_v12 = vld [vmem:[#allocation10 + $0x20] ss:$16 sps:$4 sm:$0xff]  }
  0xc8   :  { %1031 = vmatprep.subr.bf16.mxu0 %v3795_v25  ;;  %1072 = vmatprep.subr.bf16.mxu1 %v3797_v27  ;;  %v225_v25 = vld [vmem:[#allocation7 + $0x2d0] sm:$0xff]  ;;  %v3859_v27 = vcombine.high %v217_v19, %v221_v21  ;;  %v3861_v29 = vcombine.high %v218_v22, %v222_v23 }
  0xc9   :  { %v3867_v36 = vcombine.high %v225_v25, %v229_v28 }
  0xcb   :  { %1032 = vmatpush1.bf16.msra.mxu0 %v3794_v31  ;;  %1073 = vmatpush1.bf16.msra.mxu1 %v3796_v32  ;;  %v230_v31 = vld [vmem:[#allocation7 + $0x2f8] sm:$0xff]  ;;  %v3858_v32 = vcombine.low %v217_v19, %v221_v21 }
  0xcc   :  { %1033 = vmatprep.subr.bf16.mxu0 %v3803_v33  ;;  %1074 = vmatprep.subr.bf16.mxu1 %v3805_v35  ;;  %v233_v33 = vld [vmem:[#allocation7 + $0x310] sm:$0xff]  ;;  %v3860_v35 = vcombine.low %v218_v22, %v222_v23  ;;  %v4337_v19 = vld [vmem:[#allocation10 + $0x48] ss:$16 sps:$4 sm:$0xff]   ;;  %v4345_v21 = vld [vmem:[#allocation10 + $0x6c] ss:$16 sps:$4 sm:$0xff]  }
  0xcd   :  { %v3875_v43 = vcombine.high %v233_v33, %v237_v34  ;;  %v4340_v22 = vld [vmem:[#allocation10 + $0x60] ss:$16 sps:$4 sm:$0xff]   ;;  %v4343_v23 = vld [vmem:[#allocation10 + $0x68] ss:$16 sps:$4 sm:$0xff]  }
  0xcf   :  { %1034 = vmatpush1.bf16.msra.mxu0 %v3802_v39  ;;  %1075 = vmatpush1.bf16.msra.mxu1 %v3804_v40  ;;  %v3869_v39 = vcombine.high %v226_v30, %v230_v31  ;;  %v3866_v40 = vcombine.low %v225_v25, %v229_v28  ;;  %v4346_v25 = vld [vmem:[#allocation10 + $0x80] ss:$16 sps:$4 sm:$0xff]   ;;  %v4357_v28 = vld [vmem:[#allocation10 + $0xac] ss:$16 sps:$4 sm:$0xff]  }
  0xd0   :  { %1035 = vmatprep.subr.bf16.mxu0 %v3811_v41  ;;  %1076 = vmatprep.subr.bf16.mxu1 %v3813_v57  ;;  %v241_v41 = vld [vmem:[#allocation7 + $0x350] sm:$0xff]  ;;  %v3868_v57 = vcombine.low %v226_v30, %v230_v31  ;;  %v4355_v30 = vld [vmem:[#allocation10 + $0xa8] ss:$16 sps:$4 sm:$0xff]  }
  0xd1   :  { %v3883_v51 = vcombine.high %v241_v41, %v245_v42  ;;  %v4360_v31 = vld [vmem:[#allocation10 + $0xc4] ss:$16 sps:$4 sm:$0xff]  }
  0xd3   :  { %1036 = vmatpush1.bf16.msra.mxu0 %v3810_v46  ;;  %1077 = vmatpush1.bf16.msra.mxu1 %v3812_v47  ;;  %v3877_v46 = vcombine.high %v234_v37, %v238_v38  ;;  %v3874_v47 = vcombine.low %v233_v33, %v237_v34  ;;  %v4363_v33 = vld [vmem:[#allocation10 + $0xcc] ss:$16 sps:$4 sm:$0xff]   ;;  %v4361_v34 = vld [vmem:[#allocation10 + $0xc8] ss:$16 sps:$4 sm:$0xff]  }
  0xd4   :  { %1037 = vmatprep.subr.bf16.mxu0 %v3819_v48  ;;  %1078 = vmatprep.subr.bf16.mxu1 %v3821_v50  ;;  %v249_v48 = vld [vmem:[#allocation7 + $0x390] sm:$0xff]  ;;  %v3876_v50 = vcombine.low %v234_v37, %v238_v38  ;;  %v4369_v37 = vld [vmem:[#allocation10 + $0xec] ss:$16 sps:$4 sm:$0xff]  }
  0xd5   :  { %v3891_v60 = vcombine.high %v249_v48, %v253_v49  ;;  %v1381_v38 = vld [vmem:[#allocation5] sm:$0xff] }
  0xd7   :  { %1038 = vmatpush1.bf16.msra.mxu0 %v3818_v54  ;;  %1079 = vmatpush1.bf16.msra.mxu1 %v3820_v55  ;;  %v3885_v54 = vcombine.high %v242_v44, %v246_v45  ;;  %v3882_v55 = vcombine.low %v241_v41, %v245_v42  ;;  %v4370_v41 = vld [vmem:[#allocation8] ss:$16 sps:$4 sm:$0xff]   ;;  %v4375_v42 = vld [vmem:[#allocation8 + $0x204] ss:$16 sps:$4 sm:$0xff]  }
  0xd8   :  { %1039 = vmatprep.subr.bf16.mxu0 %v3827_v56  ;;  %1080 = vmatprep.subr.bf16.mxu1 %v3829_v59  ;;  %v257_v56 = vld [vmem:[#allocation7 + $0x3d0] sm:$0xff]  ;;  %v3884_v59 = vcombine.low %v242_v44, %v246_v45 }
  0xd9   :  { %v3899_v2 = vcombine.high %v257_v56, %v261_v58  ;;  %v3898_v5 = vcombine.low %v257_v56, %v261_v58  ;;  %v4378_v44 = vld [vmem:[#allocation8 + $0x24] ss:$16 sps:$4 sm:$0xff]   ;;  %v4376_v45 = vld [vmem:[#allocation8 + $0x20] ss:$16 sps:$4 sm:$0xff]  }
  0xda   :  { %v4396_v56 = vld [vmem:[#allocation8 + $0x84] ss:$16 sps:$4 sm:$0xff]   ;;  %v4394_v58 = vld [vmem:[#allocation8 + $0x80] ss:$16 sps:$4 sm:$0xff]  }
  0xdb   :  { %1040 = vmatpush1.bf16.msra.mxu0 %v3826_v63  ;;  %1081 = vmatpush1.bf16.msra.mxu1 %v3828_v0  ;;  %v3893_v63 = vcombine.high %v250_v52, %v254_v53  ;;  %v3890_v0 = vcombine.low %v249_v48, %v253_v49  ;;  %v4384_v48 = vld [vmem:[#allocation8 + $0x44] ss:$16 sps:$4 sm:$0xff]   ;;  %v4382_v49 = vld [vmem:[#allocation8 + $0x40] ss:$16 sps:$4 sm:$0xff]  }
  0xdc   :  { %1041 = vmatprep.subr.bf16.mxu0 %v3835_v1  ;;  %1082 = vmatprep.subr.bf16.mxu1 %v3837_v3  ;;  %v3892_v1 = vcombine.low %v250_v52, %v254_v53  ;;  %v3901_v3 = vcombine.high %v258_v61, %v262_v62  ;;  %v4390_v52 = vld [vmem:[#allocation8 + $0x64] ss:$16 sps:$4 sm:$0xff]   ;;  %v4388_v53 = vld [vmem:[#allocation8 + $0x60] ss:$16 sps:$4 sm:$0xff]  }
  0xdf   :  { %1042 = vmatpush1.bf16.msra.mxu0 %v3834_v7  ;;  %1083 = vmatpush1.bf16.msra.mxu1 %v3836_v8  ;;  %v3900_v7 = vcombine.low %v258_v61, %v262_v62  ;;  %v4322_v8 = vld [vmem:[#allocation10] ss:$16 sps:$4 sm:$0xff]   ;;  %v4402_v61 = vld [vmem:[#allocation8 + $0xa4] ss:$16 sps:$4 sm:$0xff]  }
  0xe0   :  { %1043 = vmatprep.subr.bf16.mxu0 %v3843_v9  ;;  %1084 = vmatprep.subr.bf16.mxu1 %v3845_v11  ;;  %v4325_v9 = vld [vmem:[#allocation10 + $0x8] ss:$16 sps:$4 sm:$0xff]   ;;  %v4333_v11 = vld [vmem:[#allocation10 + $0x2c] ss:$16 sps:$4 sm:$0xff]   ;;  %v4400_v62 = vld [vmem:[#allocation8 + $0xa0] ss:$16 sps:$4 sm:$0xff]  }
  0xe3   :  { %1044 = vmatpush1.bf16.msra.mxu0 %v3842_v16  ;;  %1085 = vmatpush1.bf16.msra.mxu1 %v3844_v17  ;;  %v4339_v16 = vld [vmem:[#allocation10 + $0x4c] ss:$16 sps:$4 sm:$0xff]   ;;  %v4334_v17 = vld [vmem:[#allocation10 + $0x40] ss:$16 sps:$4 sm:$0xff]  }
  0xe4   :  { %1045 = vmatprep.subr.bf16.mxu0 %v3851_v18  ;;  %1086 = vmatprep.subr.bf16.mxu1 %v3853_v20  ;;  %v4993_v18 = vmov 0   ;;  %v4342_v20 = vld [vmem:[#allocation10 + $0x64] ss:$16 sps:$4 sm:$0xff]  }
  0xe7   :  { %1046 = vmatpush1.bf16.msra.mxu0 %v3850_v24  ;;  %1087 = vmatpush1.bf16.msra.mxu1 %v3852_v26  ;;  %v4348_v24 = vld [vmem:[#allocation10 + $0x84] ss:$16 sps:$4 sm:$0xff]   ;;  %v4349_v26 = vld [vmem:[#allocation10 + $0x88] ss:$16 sps:$4 sm:$0xff]  }
  0xe8   :  { %1047 = vmatprep.subr.bf16.mxu0 %v3859_v27  ;;  %1088 = vmatprep.subr.bf16.mxu1 %v3861_v29  ;;  %v4354_v27 = vld [vmem:[#allocation10 + $0xa4] ss:$16 sps:$4 sm:$0xff]   ;;  %v4352_v29 = vld [vmem:[#allocation10 + $0xa0] ss:$16 sps:$4 sm:$0xff]  }
  0xeb   :  { %1048 = vmatpush1.bf16.msra.mxu0 %v3858_v32  ;;  %1089 = vmatpush1.bf16.msra.mxu1 %v3860_v35  ;;  %v4358_v32 = vld [vmem:[#allocation10 + $0xc0] ss:$16 sps:$4 sm:$0xff]   ;;  %v4366_v35 = vld [vmem:[#allocation10 + $0xe4] ss:$16 sps:$4 sm:$0xff]  }
  0xec   :  { %1049 = vmatprep.subr.bf16.mxu0 %v3867_v36  ;;  %1090 = vmatprep.subr.bf16.mxu1 %v3869_v39  ;;  %v4364_v36 = vld [vmem:[#allocation10 + $0xe0] ss:$16 sps:$4 sm:$0xff]   ;;  %v4367_v39 = vld [vmem:[#allocation10 + $0xe8] ss:$16 sps:$4 sm:$0xff]  }
  0xef   :  { %1050 = vmatpush1.bf16.msra.mxu0 %v3866_v40  ;;  %1091 = vmatpush1.bf16.msra.mxu1 %v3868_v57  ;;  %v4372_v40 = vld [vmem:[#allocation8 + $0x4] ss:$16 sps:$4 sm:$0xff]   ;;  %v1382_v57 = vpack.c.bf16 %v1381_v38, %v1381_v38 }
  0xf0   :  { %1051 = vmatprep.subr.bf16.mxu0 %v3875_v43  ;;  %1092 = vmatprep.subr.bf16.mxu1 %v3877_v46  ;;  %v4373_v43 = vld [vmem:[#allocation8 + $0x200] ss:$16 sps:$4 sm:$0xff]   ;;  %v4381_v46 = vld [vmem:[#allocation8 + $0x224] ss:$16 sps:$4 sm:$0xff]  }
  0xf1   :  { %v4465_v38 = vld [vmem:[#allocation8 + $0x3e4] ss:$16 sps:$4 sm:$0xff]  }
  0xf3   :  { %1052 = vmatpush1.bf16.msra.mxu0 %v3874_v47  ;;  %1093 = vmatpush1.bf16.msra.mxu1 %v3876_v50  ;;  %v4379_v47 = vld [vmem:[#allocation8 + $0x220] ss:$16 sps:$4 sm:$0xff]   ;;  %v4387_v50 = vld [vmem:[#allocation8 + $0x244] ss:$16 sps:$4 sm:$0xff]  }
  0xf4   :  { %1053 = vmatprep.subr.bf16.mxu0 %v3883_v51  ;;  %1094 = vmatprep.subr.bf16.mxu1 %v3885_v54  ;;  %v4385_v51 = vld [vmem:[#allocation8 + $0x240] ss:$16 sps:$4 sm:$0xff]   ;;  %v4393_v54 = vld [vmem:[#allocation8 + $0x264] ss:$16 sps:$4 sm:$0xff]  }
  0xf7   :  { %1054 = vmatpush1.bf16.msra.mxu0 %v3882_v55  ;;  %1095 = vmatpush1.bf16.msra.mxu1 %v3884_v59  ;;  %v4391_v55 = vld [vmem:[#allocation8 + $0x260] ss:$16 sps:$4 sm:$0xff]   ;;  %v4399_v59 = vld [vmem:[#allocation8 + $0x284] ss:$16 sps:$4 sm:$0xff]  }
  0xf8   :  { %1055 = vmatprep.subr.bf16.mxu0 %v3891_v60  ;;  %1096 = vmatprep.subr.bf16.mxu1 %v3893_v63  ;;  %v4397_v60 = vld [vmem:[#allocation8 + $0x280] ss:$16 sps:$4 sm:$0xff]   ;;  %v4405_v63 = vld [vmem:[#allocation8 + $0x2a4] ss:$16 sps:$4 sm:$0xff]  }
  0xfb   :  { %1056 = vmatpush1.bf16.msra.mxu0 %v3890_v0  ;;  %1097 = vmatpush1.bf16.msra.mxu1 %v3892_v1  ;;  %v4403_v0 = vld [vmem:[#allocation8 + $0x2a0] ss:$16 sps:$4 sm:$0xff]   ;;  %v4408_v1 = vld [vmem:[#allocation8 + $0xc4] ss:$16 sps:$4 sm:$0xff]  }
  0xfc   :  { %1057 = vmatprep.subr.bf16.mxu0 %v3899_v2  ;;  %1098 = vmatprep.subr.bf16.mxu1 %v3901_v3  ;;  %v4406_v2 = vld [vmem:[#allocation8 + $0xc0] ss:$16 sps:$4 sm:$0xff]   ;;  %v4411_v3 = vld [vmem:[#allocation8 + $0x2c4] ss:$16 sps:$4 sm:$0xff]  }
  0xff   :  { %1058 = vmatpush1.bf16.msra.mxu0 %v3898_v5  ;;  %1099 = vmatpush1.bf16.msra.mxu1 %v3900_v7  ;;  %v4414_v5 = vld [vmem:[#allocation8 + $0xe4] ss:$16 sps:$4 sm:$0xff]  }
 0x100   :  { %1575 = vmatprep.subr.bf16.mxu0 %v4324_v4  ;;  %1616 = vmatprep.subr.bf16.mxu1 %v4327_v6  ;;  %v4409_v4 = vld [vmem:[#allocation8 + $0x2c0] ss:$16 sps:$4 sm:$0xff]   ;;  %v4417_v7 = vld [vmem:[#allocation8 + $0x2e4] ss:$16 sps:$4 sm:$0xff]  }
 0x101   :  { %v4412_v6 = vld [vmem:[#allocation8 + $0xe0] ss:$16 sps:$4 sm:$0xff]  }
 0x102   :  { %1060 = vmatmul.mubr.bf16.vlgmr.msra.gmra.mrb[4].mxu0 %v5164_v13  ;;  %1101 = vmatmul.mubr.bf16.vlgmr.msra.gmra.mrb[4].mxu1 %v5164_v13  ;;  %v4351_v13 = vld [vmem:[#allocation10 + $0x8c] ss:$16 sps:$4 sm:$0xff]  }
 0x103   :  { %1576 = vmatpush1.bf16.msra.mxu0 %v4322_v8  ;;  %1617 = vmatpush1.bf16.msra.mxu1 %v4325_v9  ;;  %v4415_v8 = vld [vmem:[#allocation8 + $0x2e0] ss:$16 sps:$4 sm:$0xff]   ;;  %v4420_v9 = vld [vmem:[#allocation8 + $0x104] ss:$16 sps:$4 sm:$0xff]  }
 0x104   :  { %1577 = vmatprep.subr.bf16.mxu0 %v4330_v10  ;;  %1618 = vmatprep.subr.bf16.mxu1 %v4333_v11  ;;  %v4418_v10 = vld [vmem:[#allocation8 + $0x100] ss:$16 sps:$4 sm:$0xff]   ;;  %v4423_v11 = vld [vmem:[#allocation8 + $0x304] ss:$16 sps:$4 sm:$0xff]  }
 0x105   :  { %1607 = vmatprep.mubr.bf16.mxu0 %v4993_v18  ;;  %1648 = vmatprep.mubr.bf16.mxu1 %v4993_v18  ;;  %v4432_v18 = vld [vmem:[#allocation8 + $0x144] ss:$16 sps:$4 sm:$0xff]  }
 0x107   :  { %1578 = vmatpush1.bf16.msra.mxu0 %v4328_v12  ;;  %1619 = vmatpush1.bf16.msra.mxu1 %v4331_v14  ;;  %v4421_v12 = vld [vmem:[#allocation8 + $0x300] ss:$16 sps:$4 sm:$0xff]   ;;  %v4426_v14 = vld [vmem:[#allocation8 + $0x124] ss:$16 sps:$4 sm:$0xff]  }
 0x108   :  { %1579 = vmatprep.subr.bf16.mxu0 %v4336_v15  ;;  %1620 = vmatprep.subr.bf16.mxu1 %v4339_v16  ;;  %v4424_v15 = vld [vmem:[#allocation8 + $0x120] ss:$16 sps:$4 sm:$0xff]   ;;  %v4429_v16 = vld [vmem:[#allocation8 + $0x324] ss:$16 sps:$4 sm:$0xff]  }
 0x10b   :  { %1580 = vmatpush1.bf16.msra.mxu0 %v4334_v17  ;;  %1621 = vmatpush1.bf16.msra.mxu1 %v4337_v19  ;;  %v4427_v17 = vld [vmem:[#allocation8 + $0x320] ss:$16 sps:$4 sm:$0xff]  }
 0x10c   :  { %1581 = vmatprep.subr.bf16.mxu0 %v4342_v20  ;;  %1622 = vmatprep.subr.bf16.mxu1 %v4345_v21  ;;  %v4430_v19 = vld [vmem:[#allocation8 + $0x140] ss:$16 sps:$4 sm:$0xff]   ;;  %v4435_v20 = vld [vmem:[#allocation8 + $0x344] ss:$16 sps:$4 sm:$0xff]  }
 0x10d   :  { %v4433_v21 = vld [vmem:[#allocation8 + $0x340] ss:$16 sps:$4 sm:$0xff]  }
 0x10f   :  { %1582 = vmatpush1.bf16.msra.mxu0 %v4340_v22  ;;  %1623 = vmatpush1.bf16.msra.mxu1 %v4343_v23  ;;  %v4438_v22 = vld [vmem:[#allocation8 + $0x164] ss:$16 sps:$4 sm:$0xff]   ;;  %v4436_v23 = vld [vmem:[#allocation8 + $0x160] ss:$16 sps:$4 sm:$0xff]  }
 0x110   :  { %1583 = vmatprep.subr.bf16.mxu0 %v4348_v24  ;;  %1624 = vmatprep.subr.bf16.mxu1 %v4351_v13  ;;  %v4441_v24 = vld [vmem:[#allocation8 + $0x364] ss:$16 sps:$4 sm:$0xff]   ;;  %v4439_v13 = vld [vmem:[#allocation8 + $0x360] ss:$16 sps:$4 sm:$0xff]  }
 0x113   :  { %1584 = vmatpush1.bf16.msra.mxu0 %v4346_v25  ;;  %1625 = vmatpush1.bf16.msra.mxu1 %v4349_v26  ;;  %v4444_v25 = vld [vmem:[#allocation8 + $0x184] ss:$16 sps:$4 sm:$0xff]   ;;  %v4442_v26 = vld [vmem:[#allocation8 + $0x180] ss:$16 sps:$4 sm:$0xff]  }
 0x114   :  { %1585 = vmatprep.subr.bf16.mxu0 %v4354_v27  ;;  %1626 = vmatprep.subr.bf16.mxu1 %v4357_v28  ;;  %v4447_v27 = vld [vmem:[#allocation8 + $0x384] ss:$16 sps:$4 sm:$0xff]   ;;  %v4445_v28 = vld [vmem:[#allocation8 + $0x380] ss:$16 sps:$4 sm:$0xff]  }
 0x117   :  { %1586 = vmatpush1.bf16.msra.mxu0 %v4352_v29  ;;  %1627 = vmatpush1.bf16.msra.mxu1 %v4355_v30  ;;  %v4450_v29 = vld [vmem:[#allocation8 + $0x1a4] ss:$16 sps:$4 sm:$0xff]   ;;  %v4448_v30 = vld [vmem:[#allocation8 + $0x1a0] ss:$16 sps:$4 sm:$0xff]  }
 0x118   :  { %1587 = vmatprep.subr.bf16.mxu0 %v4360_v31  ;;  %1628 = vmatprep.subr.bf16.mxu1 %v4363_v33  ;;  %v4453_v31 = vld [vmem:[#allocation8 + $0x3a4] ss:$16 sps:$4 sm:$0xff]  }
 0x119   :  { %v4456_v33 = vld [vmem:[#allocation8 + $0x1c4] ss:$16 sps:$4 sm:$0xff]  }
 0x11b   :  { %1588 = vmatpush1.bf16.msra.mxu0 %v4358_v32  ;;  %1629 = vmatpush1.bf16.msra.mxu1 %v4361_v34  ;;  %v4451_v32 = vld [vmem:[#allocation8 + $0x3a0] ss:$16 sps:$4 sm:$0xff]   ;;  %v4459_v34 = vld [vmem:[#allocation8 + $0x3c4] ss:$16 sps:$4 sm:$0xff]  }
 0x11c   :  { %1589 = vmatprep.subr.bf16.mxu0 %v4366_v35  ;;  %1630 = vmatprep.subr.bf16.mxu1 %v4369_v37  ;;  %v4454_v35 = vld [vmem:[#allocation8 + $0x1c0] ss:$16 sps:$4 sm:$0xff]   ;;  %v4462_v37 = vld [vmem:[#allocation8 + $0x1e4] ss:$16 sps:$4 sm:$0xff]  }
 0x11f   :  { %1590 = vmatpush1.bf16.msra.mxu0 %v4364_v36  ;;  %1631 = vmatpush1.bf16.msra.mxu1 %v4367_v39  ;;  %v4457_v36 = vld [vmem:[#allocation8 + $0x3c0] ss:$16 sps:$4 sm:$0xff]  }
 0x120   :  { %2937 = vmatprep.subr.bf16.mxu0 %v4372_v40  ;;  %2978 = vmatprep.subr.bf16.mxu1 %v4375_v42  ;;  %v4460_v39 = vld [vmem:[#allocation8 + $0x1e0] ss:$16 sps:$4 sm:$0xff]   ;;  %v4471_v42 = vld [vmem:[#allocation8 + $0x604] ss:$16 sps:$4 sm:$0xff]  }
 0x121   :  { %v4463_v40 = vld [vmem:[#allocation8 + $0x3e0] ss:$16 sps:$4 sm:$0xff]  }
 0x122   :  { %1608 = vmatmul.mubr.bf16.vlgmr.msra.gmra.mrb[8].mxu0 %v1382_v57  ;;  %1649 = vmatmul.mubr.bf16.vlgmr.msra.gmra.mrb[8].mxu1 %v1382_v57  ;;  %v265_v57 = vlaneseq }
 0x123   :  { %2938 = vmatpush1.bf16.msra.mxu0 %v4370_v41  ;;  %2979 = vmatpush1.bf16.msra.mxu1 %v4373_v43  ;;  %v4468_v41 = vld [vmem:[#allocation8 + $0x404] ss:$16 sps:$4 sm:$0xff]  }
 0x124   :  { %2939 = vmatprep.subr.bf16.mxu0 %v4378_v44  ;;  %2980 = vmatprep.subr.bf16.mxu1 %v4381_v46  ;;  %v5172_v43 = vshrl.u32 %v265_v57, 7  ;;  %v4517_v57 = vld [vmem:[#allocation8 + $0x700] ss:$16 sps:$4 sm:$0xff]  }
 0x126   :  { %v267_v44 = vsub.s32 0, %v5172_v43  ;;  %v275_v46 = vsub.s32 2, %v5172_v43 }
 0x127   :  { %2940 = vmatpush1.bf16.msra.mxu0 %v4376_v45  ;;  %2981 = vmatpush1.bf16.msra.mxu1 %v4379_v47  ;;  %v5178_v45 = vld [vmem:[%s5285_s3] sm:$0xff]  ;;  %v271_v47 = vsub.s32 1, %v5172_v43 }
 0x128   :  { %2941 = vmatprep.subr.bf16.mxu0 %v4384_v48  ;;  %2982 = vmatprep.subr.bf16.mxu1 %v4387_v50  ;;  %v279_v48 = vsub.s32 3, %v5172_v43  ;;  %v276_v50 = vrot.slane %v5178_v45, %v275_v46 }
 0x12b   :  { %2942 = vmatpush1.bf16.msra.mxu0 %v4382_v49  ;;  %2983 = vmatpush1.bf16.msra.mxu1 %v4385_v51  ;;  %v268_v49 = vrot.slane %v5178_v45, %v267_v44  ;;  %v272_v51 = vrot.slane %v5178_v45, %v271_v47 }
 0x12c   :  { %2943 = vmatprep.subr.bf16.mxu0 %v4390_v52  ;;  %2984 = vmatprep.subr.bf16.mxu1 %v4393_v54  ;;  %v280_v52 = vrot.slane %v5178_v45, %v279_v48 }
 0x12f   :  { %2944 = vmatpush1.bf16.msra.mxu0 %v4388_v53  ;;  %2985 = vmatpush1.bf16.msra.mxu1 %v4391_v55 }
 0x130   :  { %2945 = vmatprep.subr.bf16.mxu0 %v4396_v56  ;;  %2986 = vmatprep.subr.bf16.mxu1 %v4399_v59 }
 0x133   :  { %2946 = vmatpush1.bf16.msra.mxu0 %v4394_v58  ;;  %2987 = vmatpush1.bf16.msra.mxu1 %v4397_v60 }
 0x134   :  { %2947 = vmatprep.subr.bf16.mxu0 %v4402_v61  ;;  %2988 = vmatprep.subr.bf16.mxu1 %v4405_v63 }
 0x137   :  { %2948 = vmatpush1.bf16.msra.mxu0 %v4400_v62  ;;  %2989 = vmatpush1.bf16.msra.mxu1 %v4403_v0 }
 0x138   :  { %2949 = vmatprep.subr.bf16.mxu0 %v4408_v1  ;;  %2990 = vmatprep.subr.bf16.mxu1 %v4411_v3 }
 0x13b   :  { %2950 = vmatpush1.bf16.msra.mxu0 %v4406_v2  ;;  %2991 = vmatpush1.bf16.msra.mxu1 %v4409_v4 }
 0x13c   :  { %2951 = vmatprep.subr.bf16.mxu0 %v4414_v5  ;;  %2992 = vmatprep.subr.bf16.mxu1 %v4417_v7 }
 0x13f   :  { %2952 = vmatpush1.bf16.msra.mxu0 %v4412_v6  ;;  %2993 = vmatpush1.bf16.msra.mxu1 %v4415_v8  ;;  %v4466_v8 = vld [vmem:[#allocation8 + $0x400] ss:$16 sps:$4 sm:$0xff]  }
 0x140   :  { %2953 = vmatprep.subr.bf16.mxu0 %v4420_v9  ;;  %2994 = vmatprep.subr.bf16.mxu1 %v4423_v11  ;;  %v4469_v11 = vld [vmem:[#allocation8 + $0x600] ss:$16 sps:$4 sm:$0xff]  }
 0x143   :  { %2954 = vmatpush1.bf16.msra.mxu0 %v4418_v10  ;;  %2995 = vmatpush1.bf16.msra.mxu1 %v4421_v12  ;;  %v4474_v12 = vld [vmem:[#allocation8 + $0x424] ss:$16 sps:$4 sm:$0xff]  }
 0x144   :  { %2955 = vmatprep.subr.bf16.mxu0 %v4426_v14  ;;  %2996 = vmatprep.subr.bf16.mxu1 %v4429_v16  ;;  %v4477_v14 = vld [vmem:[#allocation8 + $0x624] ss:$16 sps:$4 sm:$0xff]   ;;  %v4475_v16 = vld [vmem:[#allocation8 + $0x620] ss:$16 sps:$4 sm:$0xff]  }
 0x147   :  { %2956 = vmatpush1.bf16.msra.mxu0 %v4424_v15  ;;  %2997 = vmatpush1.bf16.msra.mxu1 %v4427_v17  ;;  %v4472_v15 = vld [vmem:[#allocation8 + $0x420] ss:$16 sps:$4 sm:$0xff]   ;;  %v4480_v17 = vld [vmem:[#allocation8 + $0x444] ss:$16 sps:$4 sm:$0xff]  }
 0x148   :  { %2957 = vmatprep.subr.bf16.mxu0 %v4432_v18  ;;  %2998 = vmatprep.subr.bf16.mxu1 %v4435_v20  ;;  %v4483_v18 = vld [vmem:[#allocation8 + $0x644] ss:$16 sps:$4 sm:$0xff]   ;;  %v4481_v20 = vld [vmem:[#allocation8 + $0x640] ss:$16 sps:$4 sm:$0xff]  }
 0x14b   :  { %2958 = vmatpush1.bf16.msra.mxu0 %v4430_v19  ;;  %2999 = vmatpush1.bf16.msra.mxu1 %v4433_v21  ;;  %v4478_v19 = vld [vmem:[#allocation8 + $0x440] ss:$16 sps:$4 sm:$0xff]   ;;  %v4486_v21 = vld [vmem:[#allocation8 + $0x464] ss:$16 sps:$4 sm:$0xff]  }
 0x14c   :  { %2959 = vmatprep.subr.bf16.mxu0 %v4438_v22  ;;  %3000 = vmatprep.subr.bf16.mxu1 %v4441_v24  ;;  %v4489_v22 = vld [vmem:[#allocation8 + $0x664] ss:$16 sps:$4 sm:$0xff]   ;;  %v4487_v24 = vld [vmem:[#allocation8 + $0x660] ss:$16 sps:$4 sm:$0xff]  }
 0x14f   :  { %2960 = vmatpush1.bf16.msra.mxu0 %v4436_v23  ;;  %3001 = vmatpush1.bf16.msra.mxu1 %v4439_v13  ;;  %v4484_v23 = vld [vmem:[#allocation8 + $0x460] ss:$16 sps:$4 sm:$0xff]   ;;  %v4492_v13 = vld [vmem:[#allocation8 + $0x484] ss:$16 sps:$4 sm:$0xff]  }
 0x150   :  { %2961 = vmatprep.subr.bf16.mxu0 %v4444_v25  ;;  %3002 = vmatprep.subr.bf16.mxu1 %v4447_v27  ;;  %v4495_v25 = vld [vmem:[#allocation8 + $0x684] ss:$16 sps:$4 sm:$0xff]   ;;  %v4493_v27 = vld [vmem:[#allocation8 + $0x680] ss:$16 sps:$4 sm:$0xff]  }
 0x153   :  { %2962 = vmatpush1.bf16.msra.mxu0 %v4442_v26  ;;  %3003 = vmatpush1.bf16.msra.mxu1 %v4445_v28  ;;  %v4490_v26 = vld [vmem:[#allocation8 + $0x480] ss:$16 sps:$4 sm:$0xff]   ;;  %v4498_v28 = vld [vmem:[#allocation8 + $0x4a4] ss:$16 sps:$4 sm:$0xff]  }
 0x154   :  { %2963 = vmatprep.subr.bf16.mxu0 %v4450_v29  ;;  %3004 = vmatprep.subr.bf16.mxu1 %v4453_v31  ;;  %v4501_v29 = vld [vmem:[#allocation8 + $0x6a4] ss:$16 sps:$4 sm:$0xff]   ;;  %v4499_v31 = vld [vmem:[#allocation8 + $0x6a0] ss:$16 sps:$4 sm:$0xff]  }
 0x157   :  { %2964 = vmatpush1.bf16.msra.mxu0 %v4448_v30  ;;  %3005 = vmatpush1.bf16.msra.mxu1 %v4451_v32  ;;  %v4496_v30 = vld [vmem:[#allocation8 + $0x4a0] ss:$16 sps:$4 sm:$0xff]   ;;  %v4504_v32 = vld [vmem:[#allocation8 + $0x4c4] ss:$16 sps:$4 sm:$0xff]  }
 0x158   :  { %2965 = vmatprep.subr.bf16.mxu0 %v4456_v33  ;;  %3006 = vmatprep.subr.bf16.mxu1 %v4459_v34  ;;  %v4507_v33 = vld [vmem:[#allocation8 + $0x6c4] ss:$16 sps:$4 sm:$0xff]   ;;  %v4502_v34 = vld [vmem:[#allocation8 + $0x4c0] ss:$16 sps:$4 sm:$0xff]  }
 0x15b   :  { %2966 = vmatpush1.bf16.msra.mxu0 %v4454_v35  ;;  %3007 = vmatpush1.bf16.msra.mxu1 %v4457_v36  ;;  %v4505_v35 = vld [vmem:[#allocation8 + $0x6c0] ss:$16 sps:$4 sm:$0xff]   ;;  %v4510_v36 = vld [vmem:[#allocation8 + $0x4e4] ss:$16 sps:$4 sm:$0xff]  }
 0x15c   :  { %2967 = vmatprep.subr.bf16.mxu0 %v4462_v37  ;;  %3008 = vmatprep.subr.bf16.mxu1 %v4465_v38  ;;  %v4513_v37 = vld [vmem:[#allocation8 + $0x6e4] ss:$16 sps:$4 sm:$0xff]   ;;  %v4508_v38 = vld [vmem:[#allocation8 + $0x4e0] ss:$16 sps:$4 sm:$0xff]  }
 0x15f   :  { %2968 = vmatpush1.bf16.msra.mxu0 %v4460_v39  ;;  %3009 = vmatpush1.bf16.msra.mxu1 %v4463_v40  ;;  %v4511_v39 = vld [vmem:[#allocation8 + $0x6e0] ss:$16 sps:$4 sm:$0xff]   ;;  %v4516_v40 = vld [vmem:[#allocation8 + $0x504] ss:$16 sps:$4 sm:$0xff]  }
 0x160   :  { %3019 = vmatprep.subr.bf16.mxu0 %v4468_v41  ;;  %3060 = vmatprep.subr.bf16.mxu1 %v4471_v42  ;;  %v4519_v41 = vld [vmem:[#allocation8 + $0x704] ss:$16 sps:$4 sm:$0xff]   ;;  %v4514_v42 = vld [vmem:[#allocation8 + $0x500] ss:$16 sps:$4 sm:$0xff]  }
 0x195   :  { %v979_v53 = vpop.f32.mrb[0].mxu0  ;;  %v1020_v55 = vpop.f32.mrb[0].mxu1 }
 0x196   :  { %v980_v54 = vadd.f32 %v979_v53, %v268_v49  ;;  %v981_v56 = vpop.f32.mrb[1].mxu0  ;;  %v1021_v58 = vadd.f32 %v1020_v55, %v276_v50  ;;  %v1022_v60 = vpop.f32.mrb[1].mxu1  ;;  %v4522_v49 = vld [vmem:[#allocation8 + $0x524] ss:$16 sps:$4 sm:$0xff]   ;;  %v4526_v55 = vld [vmem:[#allocation8 + $0x540] ss:$16 sps:$4 sm:$0xff]  }
 0x197   :  { %v982_v59 = vadd.f32 %v981_v56, %v272_v51  ;;  %v983_v61 = vpop.f32.mrb[2].mxu0  ;;  %v1023_v63 = vadd.f32 %v1022_v60, %v280_v52  ;;  %v1024_v0 = vpop.f32.mrb[2].mxu1  ;;  %v4525_v50 = vld [vmem:[#allocation8 + $0x724] ss:$16 sps:$4 sm:$0xff]   ;;  %v4520_v51 = vld [vmem:[#allocation8 + $0x520] ss:$16 sps:$4 sm:$0xff]  }
 0x198   :  { %v1109_v62 = vmax.f32 %v980_v54, 0.0  ;;  %v984_v1 = vpop.f32.mrb[3].mxu0  ;;  %v1111_v2 = vmax.f32 %v1021_v58, 0.0  ;;  %v1025_v4 = vpop.f32.mrb[3].mxu1  ;;  %v4523_v52 = vld [vmem:[#allocation8 + $0x720] ss:$16 sps:$4 sm:$0xff]  }
 0x199   :  { %v1110_v3 = vmax.f32 %v982_v59, 0.0  ;;  %v1112_v5 = vmax.f32 %v1023_v63, 0.0  ;;  %v4528_v53 = vld [vmem:[#allocation8 + $0x544] ss:$16 sps:$4 sm:$0xff]   ;;  %v4529_v56 = vld [vmem:[#allocation8 + $0x740] ss:$16 sps:$4 sm:$0xff]  }
 0x19a   :  { %v5195_v6 = vpack.c.bf16 %v1111_v2, %v1111_v2  ;;  %v5199_v9 = vpack.c.bf16 %v1109_v62, %v1109_v62  ;;  %v4531_v54 = vld [vmem:[#allocation8 + $0x744] ss:$16 sps:$4 sm:$0xff]   ;;  %v4532_v60 = vld [vmem:[#allocation8 + $0x560] ss:$16 sps:$4 sm:$0xff]   ;;  %v283_v4 = vsub.s32 4, %v5172_v43 }
 0x19b   :  { %v5197_v7 = vpack.c.bf16 %v1110_v3, %v1110_v3  ;;  %v5201_v10 = vpack.c.bf16 %v1112_v5, %v1112_v5  ;;  %v4534_v58 = vld [vmem:[#allocation8 + $0x564] ss:$16 sps:$4 sm:$0xff]   ;;  %v4535_v61 = vld [vmem:[#allocation8 + $0x760] ss:$16 sps:$4 sm:$0xff]  }
 0x19c   :  { %v4537_v59 = vld [vmem:[#allocation8 + $0x764] ss:$16 sps:$4 sm:$0xff]   ;;  %v4538_v0 = vld [vmem:[#allocation8 + $0x580] ss:$16 sps:$4 sm:$0xff]  }
 0x19d   :  { %2969 = vmatprep.mubr.bf16.mxu0 %v5197_v7  ;;  %3010 = vmatprep.mubr.bf16.mxu1 %v5201_v10  ;;  %v4540_v62 = vld [vmem:[#allocation8 + $0x584] ss:$16 sps:$4 sm:$0xff]   ;;  %v4541_v1 = vld [vmem:[#allocation8 + $0x780] ss:$16 sps:$4 sm:$0xff]  }
 0x19e   :  { %2970 = vmatmul.mubr.bf16.vlgmr.msra.gmra.mrb[12].mxu0 %v5199_v9  ;;  %3011 = vmatmul.mubr.bf16.vlgmr.msra.gmra.mrb[12].mxu1 %v5195_v6  ;;  %v4543_v63 = vld [vmem:[#allocation8 + $0x784] ss:$16 sps:$4 sm:$0xff]   ;;  %v4544_v5 = vld [vmem:[#allocation8 + $0x5a0] ss:$16 sps:$4 sm:$0xff]  }
 0x19f   :  { %3020 = vmatpush1.bf16.msra.mxu0 %v4466_v8  ;;  %3061 = vmatpush1.bf16.msra.mxu1 %v4469_v11  ;;  %v4546_v2 = vld [vmem:[#allocation8 + $0x5a4] ss:$16 sps:$4 sm:$0xff]   ;;  %v291_v8 = vsub.s32 6, %v5172_v43  ;;  %v287_v11 = vsub.s32 5, %v5172_v43 }
 0x1a0   :  { %3021 = vmatprep.subr.bf16.mxu0 %v4474_v12  ;;  %3062 = vmatprep.subr.bf16.mxu1 %v4477_v14  ;;  %v4549_v3 = vld [vmem:[#allocation8 + $0x7a4] ss:$16 sps:$4 sm:$0xff]   ;;  %v4547_v12 = vld [vmem:[#allocation8 + $0x7a0] ss:$16 sps:$4 sm:$0xff]  }
 0x1a1   :  { %v4552_v14 = vld [vmem:[#allocation8 + $0x5c4] ss:$16 sps:$4 sm:$0xff]  }
 0x1a3   :  { %3022 = vmatpush1.bf16.msra.mxu0 %v4472_v15  ;;  %3063 = vmatpush1.bf16.msra.mxu1 %v4475_v16  ;;  %v295_v15 = vsub.s32 7, %v5172_v43  ;;  %v4555_v16 = vld [vmem:[#allocation8 + $0x7c4] ss:$16 sps:$4 sm:$0xff]  }
 0x1a4   :  { %3023 = vmatprep.subr.bf16.mxu0 %v4480_v17  ;;  %3064 = vmatprep.subr.bf16.mxu1 %v4483_v18  ;;  %v284_v17 = vrot.slane %v5178_v45, %v283_v4  ;;  %v292_v18 = vrot.slane %v5178_v45, %v291_v8  ;;  %v4589_v4 = vld [vmem:[#allocation8 + $0x288] ss:$16 sps:$4 sm:$0xff]   ;;  %v4597_v8 = vld [vmem:[#allocation8 + $0x2ac] ss:$16 sps:$4 sm:$0xff]  }
 0x1a7   :  { %3024 = vmatpush1.bf16.msra.mxu0 %v4478_v19  ;;  %3065 = vmatpush1.bf16.msra.mxu1 %v4481_v20  ;;  %v4550_v19 = vld [vmem:[#allocation8 + $0x5c0] ss:$16 sps:$4 sm:$0xff]   ;;  %v288_v20 = vrot.slane %v5178_v45, %v287_v11  ;;  %v4592_v11 = vld [vmem:[#allocation8 + $0xa8] ss:$16 sps:$4 sm:$0xff]  }
 0x1a8   :  { %3025 = vmatprep.subr.bf16.mxu0 %v4486_v21  ;;  %3066 = vmatprep.subr.bf16.mxu1 %v4489_v22  ;;  %v4553_v21 = vld [vmem:[#allocation8 + $0x7c0] ss:$16 sps:$4 sm:$0xff]   ;;  %v296_v22 = vrot.slane %v5178_v45, %v295_v15  ;;  %v4564_v45 = vld [vmem:[#allocation8 + $0xc] ss:$16 sps:$4 sm:$0xff]  }
 0x1a9   :  { %v4603_v15 = vld [vmem:[#allocation8 + $0x2cc] ss:$16 sps:$4 sm:$0xff]  }
 0x1ab   :  { %3026 = vmatpush1.bf16.msra.mxu0 %v4484_v23  ;;  %3067 = vmatpush1.bf16.msra.mxu1 %v4487_v24  ;;  %v4558_v23 = vld [vmem:[#allocation8 + $0x5e4] ss:$16 sps:$4 sm:$0xff]  }
 0x1ac   :  { %3027 = vmatprep.subr.bf16.mxu0 %v4492_v13  ;;  %3068 = vmatprep.subr.bf16.mxu1 %v4495_v25  ;;  %v4561_v13 = vld [vmem:[#allocation8 + $0x7e4] ss:$16 sps:$4 sm:$0xff]  }
 0x1af   :  { %3028 = vmatpush1.bf16.msra.mxu0 %v4490_v26  ;;  %3069 = vmatpush1.bf16.msra.mxu1 %v4493_v27 }
 0x1b0   :  { %3029 = vmatprep.subr.bf16.mxu0 %v4498_v28  ;;  %3070 = vmatprep.subr.bf16.mxu1 %v4501_v29 }
 0x1b3   :  { %3030 = vmatpush1.bf16.msra.mxu0 %v4496_v30  ;;  %3071 = vmatpush1.bf16.msra.mxu1 %v4499_v31 }
 0x1b4   :  { %3031 = vmatprep.subr.bf16.mxu0 %v4504_v32  ;;  %3072 = vmatprep.subr.bf16.mxu1 %v4507_v33  ;;  %v4556_v32 = vld [vmem:[#allocation8 + $0x5e0] ss:$16 sps:$4 sm:$0xff]  }
 0x1b5   :  { %v4559_v33 = vld [vmem:[#allocation8 + $0x7e0] ss:$16 sps:$4 sm:$0xff]  }
 0x1b7   :  { %3032 = vmatpush1.bf16.msra.mxu0 %v4502_v34  ;;  %3073 = vmatpush1.bf16.msra.mxu1 %v4505_v35 }
 0x1b8   :  { %3033 = vmatprep.subr.bf16.mxu0 %v4510_v36  ;;  %3074 = vmatprep.subr.bf16.mxu1 %v4513_v37 }
 0x1bb   :  { %3034 = vmatpush1.bf16.msra.mxu0 %v4508_v38  ;;  %3075 = vmatpush1.bf16.msra.mxu1 %v4511_v39 }
 0x1bc   :  { %3035 = vmatprep.subr.bf16.mxu0 %v4516_v40  ;;  %3076 = vmatprep.subr.bf16.mxu1 %v4519_v41  ;;  %v4567_v41 = vld [vmem:[#allocation8 + $0x20c] ss:$16 sps:$4 sm:$0xff]  }
 0x1bf   :  { %3036 = vmatpush1.bf16.msra.mxu0 %v4514_v42  ;;  %3077 = vmatpush1.bf16.msra.mxu1 %v4517_v57 }
 0x1c0   :  { %3037 = vmatprep.subr.bf16.mxu0 %v4522_v49  ;;  %3078 = vmatprep.subr.bf16.mxu1 %v4525_v50  ;;  %v4562_v50 = vld [vmem:[#allocation8 + $0x8] ss:$16 sps:$4 sm:$0xff]  }
 0x1c3   :  { %3038 = vmatpush1.bf16.msra.mxu0 %v4520_v51  ;;  %3079 = vmatpush1.bf16.msra.mxu1 %v4523_v52 }
 0x1c4   :  { %3039 = vmatprep.subr.bf16.mxu0 %v4528_v53  ;;  %3080 = vmatprep.subr.bf16.mxu1 %v4531_v54  ;;  %v4565_v53 = vld [vmem:[#allocation8 + $0x208] ss:$16 sps:$4 sm:$0xff]   ;;  %v4570_v54 = vld [vmem:[#allocation8 + $0x2c] ss:$16 sps:$4 sm:$0xff]  }
 0x1c7   :  { %3040 = vmatpush1.bf16.msra.mxu0 %v4526_v55  ;;  %3081 = vmatpush1.bf16.msra.mxu1 %v4529_v56  ;;  %v4573_v55 = vld [vmem:[#allocation8 + $0x22c] ss:$16 sps:$4 sm:$0xff]   ;;  %v4568_v56 = vld [vmem:[#allocation8 + $0x28] ss:$16 sps:$4 sm:$0xff]  }
 0x1c8   :  { %3041 = vmatprep.subr.bf16.mxu0 %v4534_v58  ;;  %3082 = vmatprep.subr.bf16.mxu1 %v4537_v59  ;;  %v4571_v58 = vld [vmem:[#allocation8 + $0x228] ss:$16 sps:$4 sm:$0xff]   ;;  %v4576_v59 = vld [vmem:[#allocation8 + $0x4c] ss:$16 sps:$4 sm:$0xff]  }
 0x1cb   :  { %3042 = vmatpush1.bf16.msra.mxu0 %v4532_v60  ;;  %3083 = vmatpush1.bf16.msra.mxu1 %v4535_v61  ;;  %v4579_v60 = vld [vmem:[#allocation8 + $0x24c] ss:$16 sps:$4 sm:$0xff]   ;;  %v4574_v61 = vld [vmem:[#allocation8 + $0x48] ss:$16 sps:$4 sm:$0xff]  }
 0x1cc   :  { %3043 = vmatprep.subr.bf16.mxu0 %v4540_v62  ;;  %3084 = vmatprep.subr.bf16.mxu1 %v4543_v63  ;;  %v4577_v62 = vld [vmem:[#allocation8 + $0x248] ss:$16 sps:$4 sm:$0xff]   ;;  %v4582_v63 = vld [vmem:[#allocation8 + $0x6c] ss:$16 sps:$4 sm:$0xff]  }
 0x1cf   :  { %3044 = vmatpush1.bf16.msra.mxu0 %v4538_v0  ;;  %3085 = vmatpush1.bf16.msra.mxu1 %v4541_v1  ;;  %v4585_v0 = vld [vmem:[#allocation8 + $0x26c] ss:$16 sps:$4 sm:$0xff]   ;;  %v4580_v1 = vld [vmem:[#allocation8 + $0x68] ss:$16 sps:$4 sm:$0xff]  }
 0x1d0   :  { %3045 = vmatprep.subr.bf16.mxu0 %v4546_v2  ;;  %3086 = vmatprep.subr.bf16.mxu1 %v4549_v3  ;;  %v4588_v2 = vld [vmem:[#allocation8 + $0x8c] ss:$16 sps:$4 sm:$0xff]  }
 0x1d1   :  { %v4591_v3 = vld [vmem:[#allocation8 + $0x28c] ss:$16 sps:$4 sm:$0xff]  }
 0x1d3   :  { %3046 = vmatpush1.bf16.msra.mxu0 %v4544_v5  ;;  %3087 = vmatpush1.bf16.msra.mxu1 %v4547_v12  ;;  %v4594_v5 = vld [vmem:[#allocation8 + $0xac] ss:$16 sps:$4 sm:$0xff]   ;;  %v4595_v12 = vld [vmem:[#allocation8 + $0x2a8] ss:$16 sps:$4 sm:$0xff]  }
 0x1d4   :  { %3047 = vmatprep.subr.bf16.mxu0 %v4552_v14  ;;  %3088 = vmatprep.subr.bf16.mxu1 %v4555_v16  ;;  %v4600_v14 = vld [vmem:[#allocation8 + $0xcc] ss:$16 sps:$4 sm:$0xff]   ;;  %v4598_v16 = vld [vmem:[#allocation8 + $0xc8] ss:$16 sps:$4 sm:$0xff]  }
 0x1d5   :  { %v1061_v24 = vpop.f32.mrb[4].mxu0  ;;  %v1102_v26 = vpop.f32.mrb[4].mxu1 }
 0x1d6   :  { %v1062_v25 = vadd.f32 %v1061_v24, %v284_v17  ;;  %v1063_v27 = vpop.f32.mrb[5].mxu0  ;;  %v1103_v28 = vadd.f32 %v1102_v26, %v292_v18  ;;  %v1104_v30 = vpop.f32.mrb[5].mxu1  ;;  %v4601_v17 = vld [vmem:[#allocation8 + $0x2c8] ss:$16 sps:$4 sm:$0xff]   ;;  %v4606_v18 = vld [vmem:[#allocation8 + $0xec] ss:$16 sps:$4 sm:$0xff]  }
 0x1d7   :  { %v1064_v29 = vadd.f32 %v1063_v27, %v288_v20  ;;  %3048 = vmatpush1.bf16.msra.mxu0 %v4550_v19  ;;  %v1065_v31 = vpop.f32.mrb[6].mxu0  ;;  %v1105_v35 = vadd.f32 %v1104_v30, %v296_v22  ;;  %3089 = vmatpush1.bf16.msra.mxu1 %v4553_v21  ;;  %v1106_v36 = vpop.f32.mrb[6].mxu1  ;;  %v4609_v19 = vld [vmem:[#allocation8 + $0x2ec] ss:$16 sps:$4 sm:$0xff]  }
 0x1d8   :  { %v1113_v34 = vmax.f32 %v1062_v25, 0.0  ;;  %v1066_v37 = vpop.f32.mrb[7].mxu0  ;;  %3049 = vmatprep.subr.bf16.mxu0 %v4558_v23  ;;  %v1115_v38 = vmax.f32 %v1103_v28, 0.0  ;;  %v1107_v40 = vpop.f32.mrb[7].mxu1  ;;  %3090 = vmatprep.subr.bf16.mxu1 %v4561_v13  ;;  %v4604_v23 = vld [vmem:[#allocation8 + $0xe8] ss:$16 sps:$4 sm:$0xff]  }
 0x1d9   :  { %v1114_v39 = vmax.f32 %v1064_v29, 0.0  ;;  %v1116_v42 = vmax.f32 %v1105_v35, 0.0  ;;  %v4607_v25 = vld [vmem:[#allocation8 + $0x2e8] ss:$16 sps:$4 sm:$0xff]   ;;  %v4612_v26 = vld [vmem:[#allocation8 + $0x10c] ss:$16 sps:$4 sm:$0xff]  }
 0x1da   :  { %v5215_v57 = vpack.c.bf16 %v1115_v38, %v1115_v38  ;;  %v5219_v51 = vpack.c.bf16 %v1113_v34, %v1113_v34  ;;  %v4615_v29 = vld [vmem:[#allocation8 + $0x30c] ss:$16 sps:$4 sm:$0xff]   ;;  %v4610_v31 = vld [vmem:[#allocation8 + $0x108] ss:$16 sps:$4 sm:$0xff]  }
 0x1db   :  { %v5217_v49 = vpack.c.bf16 %v1114_v39, %v1114_v39  ;;  %3050 = vmatpush1.bf16.msra.mxu0 %v4556_v32  ;;  %v5221_v52 = vpack.c.bf16 %v1116_v42, %v1116_v42  ;;  %3091 = vmatpush1.bf16.msra.mxu1 %v4559_v33  ;;  %v4613_v32 = vld [vmem:[#allocation8 + $0x308] ss:$16 sps:$4 sm:$0xff]   ;;  %v4618_v33 = vld [vmem:[#allocation8 + $0x12c] ss:$16 sps:$4 sm:$0xff]  }
 0x1dc   :  { %3101 = vmatprep.subr.bf16.mxu0 %v4564_v45  ;;  %3142 = vmatprep.subr.bf16.mxu1 %v4567_v41  ;;  %v4621_v34 = vld [vmem:[#allocation8 + $0x32c] ss:$16 sps:$4 sm:$0xff]   ;;  %v4616_v35 = vld [vmem:[#allocation8 + $0x128] ss:$16 sps:$4 sm:$0xff]  }
 0x1dd   :  { %3051 = vmatprep.mubr.bf16.mxu0 %v5217_v49  ;;  %3092 = vmatprep.mubr.bf16.mxu1 %v5221_v52  ;;  %v4619_v36 = vld [vmem:[#allocation8 + $0x328] ss:$16 sps:$4 sm:$0xff]   ;;  %v4624_v37 = vld [vmem:[#allocation8 + $0x14c] ss:$16 sps:$4 sm:$0xff]  }
 0x1de   :  { %3052 = vmatmul.mubr.bf16.vlgmr.msra.gmra.mrb[16].mxu0 %v5219_v51  ;;  %3093 = vmatmul.mubr.bf16.vlgmr.msra.gmra.mrb[16].mxu1 %v5215_v57  ;;  %v4627_v45 = vld [vmem:[#allocation8 + $0x34c] ss:$16 sps:$4 sm:$0xff]   ;;  %v4622_v38 = vld [vmem:[#allocation8 + $0x148] ss:$16 sps:$4 sm:$0xff]  }
 0x1df   :  { %3102 = vmatpush1.bf16.msra.mxu0 %v4562_v50  ;;  %3143 = vmatpush1.bf16.msra.mxu1 %v4565_v53  ;;  %v4625_v39 = vld [vmem:[#allocation8 + $0x348] ss:$16 sps:$4 sm:$0xff]   ;;  %v4630_v40 = vld [vmem:[#allocation8 + $0x16c] ss:$16 sps:$4 sm:$0xff]  }
 0x1e0   :  { %3133 = vmatprep.mubr.bf16.mxu0 %v5197_v7  ;;  %3174 = vmatprep.mubr.bf16.mxu1 %v5201_v10  ;;  %v4583_v7 = vld [vmem:[#allocation8 + $0x268] ss:$16 sps:$4 sm:$0xff]   ;;  %v4633_v41 = vld [vmem:[#allocation8 + $0x36c] ss:$16 sps:$4 sm:$0xff]  }
 0x1e1   :  { %3103 = vmatprep.subr.bf16.mxu0 %v4570_v54  ;;  %3144 = vmatprep.subr.bf16.mxu1 %v4573_v55  ;;  %v4586_v10 = vld [vmem:[#allocation8 + $0x88] ss:$16 sps:$4 sm:$0xff]   ;;  %v4636_v53 = vld [vmem:[#allocation8 + $0x18c] ss:$16 sps:$4 sm:$0xff]  }
 0x1e2   :  { %v4628_v42 = vld [vmem:[#allocation8 + $0x168] ss:$16 sps:$4 sm:$0xff]   ;;  %v4639_v54 = vld [vmem:[#allocation8 + $0x38c] ss:$16 sps:$4 sm:$0xff]  }
 0x1e3   :  { %3104 = vmatpush1.bf16.msra.mxu0 %v4568_v56  ;;  %3145 = vmatpush1.bf16.msra.mxu1 %v4571_v58  ;;  %v4631_v50 = vld [vmem:[#allocation8 + $0x368] ss:$16 sps:$4 sm:$0xff]   ;;  %v4642_v58 = vld [vmem:[#allocation8 + $0x1ac] ss:$16 sps:$4 sm:$0xff]  }
 0x1e4   :  { %3105 = vmatprep.subr.bf16.mxu0 %v4576_v59  ;;  %3146 = vmatprep.subr.bf16.mxu1 %v4579_v60  ;;  %v4634_v55 = vld [vmem:[#allocation8 + $0x188] ss:$16 sps:$4 sm:$0xff]   ;;  %v4645_v59 = vld [vmem:[#allocation8 + $0x3ac] ss:$16 sps:$4 sm:$0xff]  }
 0x1e5   :  { %v4637_v56 = vld [vmem:[#allocation8 + $0x388] ss:$16 sps:$4 sm:$0xff]  }
 0x1e6   :  { %v4640_v60 = vld [vmem:[#allocation8 + $0x1a8] ss:$16 sps:$4 sm:$0xff]  }
 0x1e7   :  { %3106 = vmatpush1.bf16.msra.mxu0 %v4574_v61  ;;  %3147 = vmatpush1.bf16.msra.mxu1 %v4577_v62  ;;  %v4643_v61 = vld [vmem:[#allocation8 + $0x3a8] ss:$16 sps:$4 sm:$0xff]   ;;  %v4648_v62 = vld [vmem:[#allocation8 + $0x1cc] ss:$16 sps:$4 sm:$0xff]  }
 0x1e8   :  { %3107 = vmatprep.subr.bf16.mxu0 %v4582_v63  ;;  %3148 = vmatprep.subr.bf16.mxu1 %v4585_v0  ;;  %v4651_v63 = vld [vmem:[#allocation8 + $0x3cc] ss:$16 sps:$4 sm:$0xff]   ;;  %v4646_v0 = vld [vmem:[#allocation8 + $0x1c8] ss:$16 sps:$4 sm:$0xff]  }
 0x1eb   :  { %3108 = vmatpush1.bf16.msra.mxu0 %v4580_v1  ;;  %3149 = vmatpush1.bf16.msra.mxu1 %v4583_v7  ;;  %v4649_v1 = vld [vmem:[#allocation8 + $0x3c8] ss:$16 sps:$4 sm:$0xff]   ;;  %v4654_v7 = vld [vmem:[#allocation8 + $0x1ec] ss:$16 sps:$4 sm:$0xff]  }
 0x1ec   :  { %3109 = vmatprep.subr.bf16.mxu0 %v4588_v2  ;;  %3150 = vmatprep.subr.bf16.mxu1 %v4591_v3  ;;  %v4657_v2 = vld [vmem:[#allocation8 + $0x3ec] ss:$16 sps:$4 sm:$0xff]   ;;  %v4652_v3 = vld [vmem:[#allocation8 + $0x1e8] ss:$16 sps:$4 sm:$0xff]  }
 0x1ef   :  { %3110 = vmatpush1.bf16.msra.mxu0 %v4586_v10  ;;  %3151 = vmatpush1.bf16.msra.mxu1 %v4589_v4  ;;  %v4655_v10 = vld [vmem:[#allocation8 + $0x3e8] ss:$16 sps:$4 sm:$0xff]   ;;  %v4660_v4 = vld [vmem:[#allocation8 + $0x40c] ss:$16 sps:$4 sm:$0xff]  }
 0x1f0   :  { %3111 = vmatprep.subr.bf16.mxu0 %v4594_v5  ;;  %3152 = vmatprep.subr.bf16.mxu1 %v4597_v8  ;;  %v4663_v5 = vld [vmem:[#allocation8 + $0x60c] ss:$16 sps:$4 sm:$0xff]   ;;  %v4658_v8 = vld [vmem:[#allocation8 + $0x408] ss:$16 sps:$4 sm:$0xff]  }
 0x1f3   :  { %3112 = vmatpush1.bf16.msra.mxu0 %v4592_v11  ;;  %3153 = vmatpush1.bf16.msra.mxu1 %v4595_v12  ;;  %v4661_v11 = vld [vmem:[#allocation8 + $0x608] ss:$16 sps:$4 sm:$0xff]   ;;  %v4666_v12 = vld [vmem:[#allocation8 + $0x42c] ss:$16 sps:$4 sm:$0xff]  }
 0x1f4   :  { %3113 = vmatprep.subr.bf16.mxu0 %v4600_v14  ;;  %3154 = vmatprep.subr.bf16.mxu1 %v4603_v15  ;;  %v4669_v14 = vld [vmem:[#allocation8 + $0x62c] ss:$16 sps:$4 sm:$0xff]   ;;  %v4664_v15 = vld [vmem:[#allocation8 + $0x428] ss:$16 sps:$4 sm:$0xff]  }
 0x1f5   :  { %v5229_v20 = vpop.f32.mrb[8].mxu0  ;;  %v5233_v22 = vpop.f32.mrb[8].mxu1 }
 0x1f6   :  { %v5231_v21 = vpop.f32.mrb[9].mxu0  ;;  %v5235_v13 = vpop.f32.mrb[9].mxu1 }
 0x1f7   :  { %3114 = vmatpush1.bf16.msra.mxu0 %v4598_v16  ;;  %v1613_v24 = vpop.f32.mrb[10].mxu0  ;;  %3155 = vmatpush1.bf16.msra.mxu1 %v4601_v17  ;;  %v1654_v28 = vpop.f32.mrb[10].mxu1  ;;  %v4667_v16 = vld [vmem:[#allocation8 + $0x628] ss:$16 sps:$4 sm:$0xff]   ;;  %v4672_v17 = vld [vmem:[#allocation8 + $0x44c] ss:$16 sps:$4 sm:$0xff]  }
 0x1f8   :  { %3115 = vmatprep.subr.bf16.mxu0 %v4606_v18  ;;  %v1614_v27 = vpop.f32.mrb[11].mxu0  ;;  %3156 = vmatprep.subr.bf16.mxu1 %v4609_v19  ;;  %v1655_v30 = vpop.f32.mrb[11].mxu1  ;;  %v4675_v18 = vld [vmem:[#allocation8 + $0x64c] ss:$16 sps:$4 sm:$0xff]   ;;  %v4670_v19 = vld [vmem:[#allocation8 + $0x448] ss:$16 sps:$4 sm:$0xff]  }
 0x1f9   :  { %v4676_v24 = vld [vmem:[#allocation8 + $0x468] ss:$16 sps:$4 sm:$0xff]   ;;  %v4690_v28 = vld [vmem:[#allocation8 + $0x4ac] ss:$16 sps:$4 sm:$0xff]  }
 0x1fa   :  { %v4685_v27 = vld [vmem:[#allocation8 + $0x688] ss:$16 sps:$4 sm:$0xff]  }
 0x1fb   :  { %3116 = vmatpush1.bf16.msra.mxu0 %v4604_v23  ;;  %3157 = vmatpush1.bf16.msra.mxu1 %v4607_v25  ;;  %v4678_v23 = vld [vmem:[#allocation8 + $0x46c] ss:$16 sps:$4 sm:$0xff]   ;;  %v4688_v30 = vld [vmem:[#allocation8 + $0x4a8] ss:$16 sps:$4 sm:$0xff]  }
 0x1fc   :  { %3117 = vmatprep.subr.bf16.mxu0 %v4612_v26  ;;  %3158 = vmatprep.subr.bf16.mxu1 %v4615_v29  ;;  %v4684_v25 = vld [vmem:[#allocation8 + $0x48c] ss:$16 sps:$4 sm:$0xff]  }
 0x1fd   :  { %v4687_v26 = vld [vmem:[#allocation8 + $0x68c] ss:$16 sps:$4 sm:$0xff]  }
 0x1fe   :  { %v4693_v29 = vld [vmem:[#allocation8 + $0x6ac] ss:$16 sps:$4 sm:$0xff]  }
 0x1ff   :  { %3118 = vmatpush1.bf16.msra.mxu0 %v4610_v31  ;;  %3159 = vmatpush1.bf16.msra.mxu1 %v4613_v32  ;;  %v4691_v31 = vld [vmem:[#allocation8 + $0x6a8] ss:$16 sps:$4 sm:$0xff]   ;;  %v4696_v32 = vld [vmem:[#allocation8 + $0x4cc] ss:$16 sps:$4 sm:$0xff]  }
 0x200   :  { %3119 = vmatprep.subr.bf16.mxu0 %v4618_v33  ;;  %3160 = vmatprep.subr.bf16.mxu1 %v4621_v34  ;;  %v4699_v33 = vld [vmem:[#allocation8 + $0x6cc] ss:$16 sps:$4 sm:$0xff]   ;;  %v4694_v34 = vld [vmem:[#allocation8 + $0x4c8] ss:$16 sps:$4 sm:$0xff]  }
 0x203   :  { %3120 = vmatpush1.bf16.msra.mxu0 %v4616_v35  ;;  %3161 = vmatpush1.bf16.msra.mxu1 %v4619_v36  ;;  %v4697_v35 = vld [vmem:[#allocation8 + $0x6c8] ss:$16 sps:$4 sm:$0xff]   ;;  %v4702_v36 = vld [vmem:[#allocation8 + $0x4ec] ss:$16 sps:$4 sm:$0xff]  }
 0x204   :  { %3121 = vmatprep.subr.bf16.mxu0 %v4624_v37  ;;  %3162 = vmatprep.subr.bf16.mxu1 %v4627_v45  ;;  %v4705_v37 = vld [vmem:[#allocation8 + $0x6ec] ss:$16 sps:$4 sm:$0xff]   ;;  %v4700_v45 = vld [vmem:[#allocation8 + $0x4e8] ss:$16 sps:$4 sm:$0xff]  }
 0x207   :  { %3122 = vmatpush1.bf16.msra.mxu0 %v4622_v38  ;;  %3163 = vmatpush1.bf16.msra.mxu1 %v4625_v39  ;;  %v4703_v38 = vld [vmem:[#allocation8 + $0x6e8] ss:$16 sps:$4 sm:$0xff]   ;;  %v4708_v39 = vld [vmem:[#allocation8 + $0x50c] ss:$16 sps:$4 sm:$0xff]  }
 0x208   :  { %3123 = vmatprep.subr.bf16.mxu0 %v4630_v40  ;;  %3164 = vmatprep.subr.bf16.mxu1 %v4633_v41  ;;  %v4711_v40 = vld [vmem:[#allocation8 + $0x70c] ss:$16 sps:$4 sm:$0xff]   ;;  %v4706_v41 = vld [vmem:[#allocation8 + $0x508] ss:$16 sps:$4 sm:$0xff]  }
 0x20b   :  { %3124 = vmatpush1.bf16.msra.mxu0 %v4628_v42  ;;  %3165 = vmatpush1.bf16.msra.mxu1 %v4631_v50  ;;  %v4709_v42 = vld [vmem:[#allocation8 + $0x708] ss:$16 sps:$4 sm:$0xff]   ;;  %v4714_v50 = vld [vmem:[#allocation8 + $0x52c] ss:$16 sps:$4 sm:$0xff]  }
 0x20c   :  { %3125 = vmatprep.subr.bf16.mxu0 %v4636_v53  ;;  %3166 = vmatprep.subr.bf16.mxu1 %v4639_v54  ;;  %v4717_v53 = vld [vmem:[#allocation8 + $0x72c] ss:$16 sps:$4 sm:$0xff]   ;;  %v4712_v54 = vld [vmem:[#allocation8 + $0x528] ss:$16 sps:$4 sm:$0xff]  }
 0x20f   :  { %3126 = vmatpush1.bf16.msra.mxu0 %v4634_v55  ;;  %3167 = vmatpush1.bf16.msra.mxu1 %v4637_v56  ;;  %v4715_v55 = vld [vmem:[#allocation8 + $0x728] ss:$16 sps:$4 sm:$0xff]   ;;  %v4720_v56 = vld [vmem:[#allocation8 + $0x54c] ss:$16 sps:$4 sm:$0xff]  }
 0x210   :  { %3127 = vmatprep.subr.bf16.mxu0 %v4642_v58  ;;  %3168 = vmatprep.subr.bf16.mxu1 %v4645_v59  ;;  %v4723_v58 = vld [vmem:[#allocation8 + $0x74c] ss:$16 sps:$4 sm:$0xff]   ;;  %v4718_v59 = vld [vmem:[#allocation8 + $0x548] ss:$16 sps:$4 sm:$0xff]  }
 0x213   :  { %3128 = vmatpush1.bf16.msra.mxu0 %v4640_v60  ;;  %3169 = vmatpush1.bf16.msra.mxu1 %v4643_v61  ;;  %v4721_v60 = vld [vmem:[#allocation8 + $0x748] ss:$16 sps:$4 sm:$0xff]   ;;  %v4726_v61 = vld [vmem:[#allocation8 + $0x56c] ss:$16 sps:$4 sm:$0xff]  }
 0x214   :  { %3129 = vmatprep.subr.bf16.mxu0 %v4648_v62  ;;  %3170 = vmatprep.subr.bf16.mxu1 %v4651_v63  ;;  %v4729_v62 = vld [vmem:[#allocation8 + $0x76c] ss:$16 sps:$4 sm:$0xff]   ;;  %v4724_v63 = vld [vmem:[#allocation8 + $0x568] ss:$16 sps:$4 sm:$0xff]  }
 0x217   :  { %3130 = vmatpush1.bf16.msra.mxu0 %v4646_v0  ;;  %3171 = vmatpush1.bf16.msra.mxu1 %v4649_v1  ;;  %v4727_v0 = vld [vmem:[#allocation8 + $0x768] ss:$16 sps:$4 sm:$0xff]   ;;  %v4732_v1 = vld [vmem:[#allocation8 + $0x58c] ss:$16 sps:$4 sm:$0xff]  }
 0x218   :  { %3131 = vmatprep.subr.bf16.mxu0 %v4654_v7  ;;  %3172 = vmatprep.subr.bf16.mxu1 %v4657_v2  ;;  %v4735_v7 = vld [vmem:[#allocation8 + $0x78c] ss:$16 sps:$4 sm:$0xff]   ;;  %v4730_v2 = vld [vmem:[#allocation8 + $0x588] ss:$16 sps:$4 sm:$0xff]  }
 0x21b   :  { %3132 = vmatpush1.bf16.msra.mxu0 %v4652_v3  ;;  %3173 = vmatpush1.bf16.msra.mxu1 %v4655_v10  ;;  %v4733_v3 = vld [vmem:[#allocation8 + $0x788] ss:$16 sps:$4 sm:$0xff]   ;;  %v4738_v10 = vld [vmem:[#allocation8 + $0x5ac] ss:$16 sps:$4 sm:$0xff]  }
 0x21c   :  { %3183 = vmatprep.subr.bf16.mxu0 %v4660_v4  ;;  %3224 = vmatprep.subr.bf16.mxu1 %v4663_v5  ;;  %v4741_v4 = vld [vmem:[#allocation8 + $0x7ac] ss:$16 sps:$4 sm:$0xff]   ;;  %v4736_v5 = vld [vmem:[#allocation8 + $0x5a8] ss:$16 sps:$4 sm:$0xff]  }
 0x21e   :  { %3134 = vmatmul.mubr.bf16.vlgmr.msra.gmra.mrb[20].mxu0 %v5199_v9  ;;  %3175 = vmatmul.mubr.bf16.vlgmr.msra.gmra.mrb[20].mxu1 %v5195_v6  ;;  %v4673_v9 = vld [vmem:[#allocation8 + $0x648] ss:$16 sps:$4 sm:$0xff]   ;;  %v4681_v6 = vld [vmem:[#allocation8 + $0x66c] ss:$16 sps:$4 sm:$0xff]  }
 0x21f   :  { %3184 = vmatpush1.bf16.msra.mxu0 %v4658_v8  ;;  %3215 = vmatprep.mubr.bf16.mxu0 %v5217_v49  ;;  %v4679_v49 = vld [vmem:[#allocation8 + $0x668] ss:$16 sps:$4 sm:$0xff]  }
 0x220   :  { %3225 = vmatpush1.bf16.msra.mxu1 %v4661_v11  ;;  %3256 = vmatprep.mubr.bf16.mxu1 %v5221_v52  ;;  %v4682_v52 = vld [vmem:[#allocation8 + $0x488] ss:$16 sps:$4 sm:$0xff]   ;;  %v4744_v11 = vld [vmem:[#allocation8 + $0x5cc] ss:$16 sps:$4 sm:$0xff]  }
 0x221   :  { %3185 = vmatprep.subr.bf16.mxu0 %v4666_v12  ;;  %3226 = vmatprep.subr.bf16.mxu1 %v4669_v14  ;;  %v4739_v8 = vld [vmem:[#allocation8 + $0x7a8] ss:$16 sps:$4 sm:$0xff]   ;;  %v4747_v12 = vld [vmem:[#allocation8 + $0x7cc] ss:$16 sps:$4 sm:$0xff]  }
 0x222   :  { %v4742_v14 = vld [vmem:[#allocation8 + $0x5c8] ss:$16 sps:$4 sm:$0xff]  }
 0x223   :  { %3186 = vmatpush1.bf16.msra.mxu0 %v4664_v15  ;;  %v4745_v15 = vld [vmem:[#allocation8 + $0x7c8] ss:$16 sps:$4 sm:$0xff]  }
 0x224   :  { %3227 = vmatpush1.bf16.msra.mxu1 %v4667_v16  ;;  %3187 = vmatprep.subr.bf16.mxu0 %v4672_v17  ;;  %v4750_v16 = vld [vmem:[#allocation8 + $0x5ec] ss:$16 sps:$4 sm:$0xff]  }
 0x225   :  { %3228 = vmatprep.subr.bf16.mxu1 %v4675_v18  ;;  %v4753_v17 = vld [vmem:[#allocation8 + $0x7ec] ss:$16 sps:$4 sm:$0xff]   ;;  %v4748_v18 = vld [vmem:[#allocation8 + $0x5e8] ss:$16 sps:$4 sm:$0xff]  }
 0x227   :  { %3188 = vmatpush1.bf16.msra.mxu0 %v4670_v19  ;;  %v4751_v19 = vld [vmem:[#allocation8 + $0x7e8] ss:$16 sps:$4 sm:$0xff]  }
 0x228   :  { %3229 = vmatpush1.bf16.msra.mxu1 %v4673_v9  ;;  %3189 = vmatprep.subr.bf16.mxu0 %v4678_v23  ;;  %v4754_v9 = vld [vmem:[#allocation11 + $0x40] sm:$0xff]  }
 0x229   :  { %3230 = vmatprep.subr.bf16.mxu1 %v4681_v6  ;;  %v4755_v23 = vld [vmem:[#allocation11] sm:$0xff]   ;;  %v4756_v6 = vld [vmem:[#allocation11 + $0x48] sm:$0xff]  }
 0x22b   :  { %3190 = vmatpush1.bf16.msra.mxu0 %v4676_v24  ;;  %v4757_v24 = vld [vmem:[#allocation11 + $0x8] sm:$0xff]  }
 0x22c   :  { %3231 = vmatpush1.bf16.msra.mxu1 %v4679_v49  ;;  %3191 = vmatprep.subr.bf16.mxu0 %v4684_v25  ;;  %v4758_v49 = vld [vmem:[#allocation11 + $0x50] sm:$0xff]  }
 0x22d   :  { %3232 = vmatprep.subr.bf16.mxu1 %v4687_v26  ;;  %v4759_v25 = vld [vmem:[#allocation11 + $0x10] sm:$0xff]   ;;  %v4760_v26 = vld [vmem:[#allocation11 + $0x58] sm:$0xff]  }
 0x22f   :  { %3192 = vmatpush1.bf16.msra.mxu0 %v4682_v52  ;;  %v4761_v52 = vld [vmem:[#allocation11 + $0x18] sm:$0xff]  }
 0x230   :  { %3233 = vmatpush1.bf16.msra.mxu1 %v4685_v27  ;;  %3193 = vmatprep.subr.bf16.mxu0 %v4690_v28  ;;  %v4762_v27 = vld [vmem:[#allocation11 + $0x60] sm:$0xff]  }
 0x231   :  { %3234 = vmatprep.subr.bf16.mxu1 %v4693_v29  ;;  %v4763_v28 = vld [vmem:[#allocation11 + $0x20] sm:$0xff]   ;;  %v4764_v29 = vld [vmem:[#allocation11 + $0x68] sm:$0xff]  }
 0x233   :  { %3194 = vmatpush1.bf16.msra.mxu0 %v4688_v30 }
 0x234   :  { %3235 = vmatpush1.bf16.msra.mxu1 %v4691_v31  ;;  %3195 = vmatprep.subr.bf16.mxu0 %v4696_v32 }
 0x235   :  { %3236 = vmatprep.subr.bf16.mxu1 %v4699_v33 }
 0x237   :  { %3196 = vmatpush1.bf16.msra.mxu0 %v4694_v34 }
 0x238   :  { %3237 = vmatpush1.bf16.msra.mxu1 %v4697_v35  ;;  %3197 = vmatprep.subr.bf16.mxu0 %v4702_v36 }
 0x239   :  { %3238 = vmatprep.subr.bf16.mxu1 %v4705_v37  ;;  %v4767_v37 = vld [vmem:[#allocation11 + $0x30] sm:$0xff]  }
 0x23b   :  { %3198 = vmatpush1.bf16.msra.mxu0 %v4700_v45 }
 0x23c   :  { %3239 = vmatpush1.bf16.msra.mxu1 %v4703_v38  ;;  %3199 = vmatprep.subr.bf16.mxu0 %v4708_v39 }
 0x23d   :  { %3240 = vmatprep.subr.bf16.mxu1 %v4711_v40  ;;  %v4768_v40 = vld [vmem:[#allocation11 + $0x78] sm:$0xff]  }
 0x23f   :  { %3200 = vmatpush1.bf16.msra.mxu0 %v4706_v41 }
 0x240   :  { %3241 = vmatpush1.bf16.msra.mxu1 %v4709_v42  ;;  %3201 = vmatprep.subr.bf16.mxu0 %v4714_v50  ;;  %v4770_v50 = vld [vmem:[#allocation11 + $0xc0] sm:$0xff]  }
 0x241   :  { %3242 = vmatprep.subr.bf16.mxu1 %v4717_v53  ;;  %v4771_v53 = vld [vmem:[#allocation11 + $0x80] sm:$0xff]  }
 0x243   :  { %3202 = vmatpush1.bf16.msra.mxu0 %v4712_v54  ;;  %v4772_v54 = vld [vmem:[#allocation11 + $0xc8] sm:$0xff]  }
 0x244   :  { %3243 = vmatpush1.bf16.msra.mxu1 %v4715_v55  ;;  %3203 = vmatprep.subr.bf16.mxu0 %v4720_v56  ;;  %v4774_v55 = vld [vmem:[#allocation11 + $0xd0] sm:$0xff]  }
 0x245   :  { %3244 = vmatprep.subr.bf16.mxu1 %v4723_v58  ;;  %v4775_v56 = vld [vmem:[#allocation11 + $0x90] sm:$0xff]   ;;  %v4776_v58 = vld [vmem:[#allocation11 + $0xd8] sm:$0xff]  }
 0x247   :  { %3204 = vmatpush1.bf16.msra.mxu0 %v4718_v59  ;;  %v4777_v59 = vld [vmem:[#allocation11 + $0x98] sm:$0xff]  }
 0x248   :  { %3245 = vmatpush1.bf16.msra.mxu1 %v4721_v60  ;;  %3205 = vmatprep.subr.bf16.mxu0 %v4726_v61  ;;  %v4778_v60 = vld [vmem:[#allocation11 + $0xe0] sm:$0xff]  }
 0x249   :  { %3246 = vmatprep.subr.bf16.mxu1 %v4729_v62  ;;  %v4779_v61 = vld [vmem:[#allocation11 + $0xa0] sm:$0xff]   ;;  %v5248_v62 = vld [vmem:[%s5288_s6] sm:$0xf] }
 0x24b   :  { %3206 = vmatpush1.bf16.msra.mxu0 %v4724_v63 }
 0x24c   :  { %3247 = vmatpush1.bf16.msra.mxu1 %v4727_v0  ;;  %3207 = vmatprep.subr.bf16.mxu0 %v4732_v1 }
 0x24d   :  { %3248 = vmatprep.subr.bf16.mxu1 %v4735_v7  ;;  %v3270_v7 = vrot.slane %v5248_v62, %v267_v44 }
 0x24f   :  { %3208 = vmatpush1.bf16.msra.mxu0 %v4730_v2 }
 0x250   :  { %3249 = vmatpush1.bf16.msra.mxu1 %v4733_v3  ;;  %3209 = vmatprep.subr.bf16.mxu0 %v4738_v10  ;;  %v4780_v3 = vld [vmem:[#allocation11 + $0xe8] sm:$0xff]  }
 0x251   :  { %3250 = vmatprep.subr.bf16.mxu1 %v4741_v4 }
 0x253   :  { %3210 = vmatpush1.bf16.msra.mxu0 %v4736_v5  ;;  %v3274_v5 = vrot.slane %v5248_v62, %v271_v47  ;;  %v4785_v47 = vld [vmem:[#allocation11 + $0xb8] sm:$0xff]  }
 0x254   :  { %3251 = vmatpush1.bf16.msra.mxu1 %v4739_v8  ;;  %3211 = vmatprep.subr.bf16.mxu0 %v4744_v11  ;;  %v4781_v11 = vld [vmem:[#allocation11 + $0xa8] sm:$0xff]  }
 0x255   :  { %3252 = vmatprep.subr.bf16.mxu1 %v4747_v12 }
 0x257   :  { %3212 = vmatpush1.bf16.msra.mxu0 %v4742_v14 }
 0x258   :  { %3253 = vmatpush1.bf16.msra.mxu1 %v4745_v15  ;;  %3213 = vmatprep.subr.bf16.mxu0 %v4750_v16 }
 0x259   :  { %3254 = vmatprep.subr.bf16.mxu1 %v4753_v17 }
 0x25b   :  { %3214 = vmatpush1.bf16.msra.mxu0 %v4748_v18 }
 0x25c   :  { %3255 = vmatpush1.bf16.msra.mxu1 %v4751_v19  ;;  %4232 = vmatprep.subr.bf16.mxu0 %v4754_v9  ;;  %v4782_v19 = vld [vmem:[#allocation11 + $0xf0] sm:$0xff]  }
 0x25d   :  { %4254 = vmatprep.subr.bf16.mxu1 %v4770_v50  ;;  %v4783_v9 = vld [vmem:[#allocation11 + $0xb0] sm:$0xff]  }
 0x25e   :  { %3216 = vmatmul.mubr.bf16.vlgmr.msra.gmra.mrb[24].mxu0 %v5219_v51  ;;  %v4765_v51 = vld [vmem:[#allocation11 + $0x28] sm:$0xff]  }
 0x25f   :  { %3257 = vmatmul.mubr.bf16.vlgmr.msra.gmra.mrb[24].mxu1 %v5215_v57  ;;  %4233 = vmatpush3.bf16.msra.mxu0 %v4755_v23  ;;  %v4766_v57 = vld [vmem:[#allocation11 + $0x70] sm:$0xff]  }
 0x260   :  { %4234 = vmatprep.subr.bf16.mxu0 %v4756_v6  ;;  %4255 = vmatpush3.bf16.msra.mxu1 %v4771_v53 }
 0x261   :  { %4256 = vmatprep.subr.bf16.mxu1 %v4772_v54 }
 0x263   :  { %4235 = vmatpush3.bf16.msra.mxu0 %v4757_v24  ;;  %v4784_v24 = vld [vmem:[#allocation11 + $0xf8] sm:$0xff]  }
 0x264   :  { %4236 = vmatprep.subr.bf16.mxu0 %v4758_v49 }
 0x267   :  { %4237 = vmatpush3.bf16.msra.mxu0 %v4759_v25 }
 0x268   :  { %4238 = vmatprep.subr.bf16.mxu0 %v4760_v26 }
 0x26b   :  { %4239 = vmatpush3.bf16.msra.mxu0 %v4761_v52 }
 0x26c   :  { %4240 = vmatprep.subr.bf16.mxu0 %v4762_v27 }
 0x26f   :  { %4241 = vmatpush3.bf16.msra.mxu0 %v4763_v28 }
 0x270   :  { %4242 = vmatprep.subr.bf16.mxu0 %v4764_v29 }
 0x271   :  { %v2971_v30 = vpop.f32.mrb[12].mxu0  ;;  %v3012_v32 = vpop.f32.mrb[12].mxu1 }
 0x272   :  { %v2972_v31 = vadd.f32 %v2971_v30, %v5229_v20  ;;  %v2973_v33 = vpop.f32.mrb[13].mxu0  ;;  %v3014_v35 = vpop.f32.mrb[13].mxu1  ;;  %v4769_v20 = vld [vmem:[#allocation11 + $0x38] sm:$0xff]  }
 0x273   :  { %v2974_v34 = vadd.f32 %v2973_v33, %v5231_v21  ;;  %v2975_v36 = vpop.f32.mrb[14].mxu0  ;;  %4243 = vmatpush3.bf16.msra.mxu0 %v4765_v51  ;;  %v3016_v38 = vpop.f32.mrb[14].mxu1  ;;  %v4773_v21 = vld [vmem:[#allocation11 + $0x88] sm:$0xff]  }
 0x274   :  { %v3013_v45 = vadd.f32 %v3012_v32, %v2972_v31  ;;  %v2976_v39 = vpop.f32.mrb[15].mxu0  ;;  %4244 = vmatprep.subr.bf16.mxu0 %v4766_v57  ;;  %v3017_v42 = vpop.f32.mrb[15].mxu1  ;;  %4257 = vmatpush3.bf16.msra.mxu1 %v4773_v21  ;;  %v4994_v36 = vmov 0.0   ;;  %v4791_v38 = vld [vmem:[#allocation13 + $0x28] sm:$0xff]  }
 0x275   :  { %v3015_v41 = vadd.f32 %v3014_v35, %v2974_v34  ;;  %4258 = vmatprep.subr.bf16.mxu1 %v4774_v55  ;;  %v4786_v35 = vld [vmem:[#allocation13] sm:$0xff]   ;;  %v3278_v42 = vrot.slane %v5248_v62, %v275_v46 }
 0x277   :  { %4245 = vmatpush3.bf16.msra.mxu0 %v4767_v37  ;;  %v4787_v37 = vld [vmem:[#allocation13 + $0x8] sm:$0xff]  }
 0x278   :  { %4246 = vmatprep.subr.bf16.mxu0 %v4768_v40  ;;  %4259 = vmatpush3.bf16.msra.mxu1 %v4775_v56 }
 0x279   :  { %4260 = vmatprep.subr.bf16.mxu1 %v4776_v58 }
 0x27b   :  { %4247 = vmatpush3.bf16.msra.mxu0 %v4769_v20  ;;  %v3282_v20 = vrot.slane %v5248_v62, %v279_v48  ;;  %v4792_v48 = vld [vmem:[#allocation13 + $0x30] sm:$0xff]   ;;  %v4793_v62 = vld [vmem:[#allocation13 + $0x38] sm:$0xff]  }
 0x27c   :  { %4261 = vmatpush3.bf16.msra.mxu1 %v4777_v59  ;;  %4285 = vmatprep.subr.bf16.mxu0 %v4994_v36 }
 0x27d   :  { %4262 = vmatprep.subr.bf16.mxu1 %v4778_v60 }
 0x280   :  { %4263 = vmatpush3.bf16.msra.mxu1 %v4779_v61 }
 0x281   :  { %4264 = vmatprep.subr.bf16.mxu1 %v4780_v3 }
 0x284   :  { %4265 = vmatpush3.bf16.msra.mxu1 %v4781_v11 }
 0x285   :  { %4266 = vmatprep.subr.bf16.mxu1 %v4782_v19 }
 0x288   :  { %4267 = vmatpush3.bf16.msra.mxu1 %v4783_v9 }
 0x289   :  { %4268 = vmatprep.subr.bf16.mxu1 %v4784_v24 }
 0x28c   :  { %4269 = vmatpush3.bf16.msra.mxu1 %v4785_v47 }
 0x2b1   :  { %v3053_v63 = vpop.f32.mrb[16].mxu0  ;;  %v3094_v1 = vpop.f32.mrb[16].mxu1 }
 0x2b2   :  { %v3054_v0 = vadd.f32 %v3053_v63, %v3013_v45  ;;  %v3055_v2 = vpop.f32.mrb[17].mxu0  ;;  %v3096_v4 = vpop.f32.mrb[17].mxu1  ;;  %v4788_v45 = vld [vmem:[#allocation13 + $0x10] sm:$0xff]  }
 0x2b3   :  { %v3056_v10 = vadd.f32 %v3055_v2, %v3015_v41  ;;  %v3057_v8 = vpop.f32.mrb[18].mxu0  ;;  %v3098_v14 = vpop.f32.mrb[18].mxu1 }
 0x2b4   :  { %v3095_v12 = vadd.f32 %v3094_v1, %v3054_v0  ;;  %v3058_v15 = vpop.f32.mrb[19].mxu0  ;;  %v3099_v17 = vpop.f32.mrb[19].mxu1 }
 0x2b5   :  { %v3097_v16 = vadd.f32 %v3096_v4, %v3056_v10 }
 0x2b6   :  { %v3287_v18 = vadd.f32 %v3270_v7, %v3095_v12 }
 0x2b7   :  { %v3288_v44 = vadd.f32 %v3274_v5, %v3097_v16  ;;  %v4190_v5 = vld [vmem:[%s5290_s8] ss:$0 sm:$0xff]  ;;  %s4948_s8 = scalar_lea.vmem %s3763_s12, 128 }
 0x2b8   :  { %v3291_v23 = vmax.f32 %v3287_v18, 0.0  ;;  %p4949_p0 = scmp.ne.s32.totalorder %s3763_s12, %s4948_s8  ;;  %p4954_p2 = scmp.lt.s32.totalorder %s4948_s8, %s4948_s8 }
 0x2b9   :  { %v3292_v6 = vmax.f32 %v3288_v44, 0.0  ;;  %v4223_v44 = vld [vmem:[%s5292_s10] ss:$0 sm:$0xff] }
 0x2ba   :  { %v3295_v25 = vpack.c.bf16 %v3291_v23, %v3291_v23  ;;  %p4955_p3 = por %p4954_p2, %p4953_p1 }
 0x2bb   :  { %v3296_v49 = vpack.c.bf16 %v3292_v6, %v3292_v6 }
 0x2bc   :  { %p4956_p4 = pnand %p4955_p3, %p4949_p0 }
 0x2bd   :  { %3594 = vmatprep.mubr.bf16.mxu0 %v3296_v49 }
 0x2be   :  { %3595 = vmatmul.mubr.bf16.vlgmr.msra.gmra.mrb[28].mxu0 %v3295_v25 }
 0x2bf   :  { %4286 = vmatpush3.bf16.msra.mxu0 %v4786_v35  ;;  %4301 = vmatprep.mubr.msk.bf16.mxu0 %vm4995_vm0, %v4994_v36 }
 0x2c0   :  { %4287 = vmatprep.subr.bf16.mxu0 %v4994_v36 }
 0x2c3   :  { %4288 = vmatpush3.bf16.msra.mxu0 %v4787_v37 }
 0x2c4   :  { %4289 = vmatprep.subr.bf16.mxu0 %v4994_v36 }
 0x2c7   :  { %4290 = vmatpush3.bf16.msra.mxu0 %v4788_v45 }
 0x2c8   :  { %4291 = vmatprep.subr.bf16.mxu0 %v4994_v36 }
 0x2f1   :  { %v3135_v26 = vpop.f32.mrb[20].mxu0  ;;  %v3176_v27 = vpop.f32.mrb[20].mxu1 }
 0x2f2   :  { %v3136_v52 = vadd.f32 %v3135_v26, %v5233_v22  ;;  %v3137_v28 = vpop.f32.mrb[21].mxu0  ;;  %v3178_v51 = vpop.f32.mrb[21].mxu1  ;;  %v4789_v22 = vld [vmem:[#allocation13 + $0x18] sm:$0xff]  }
 0x2f3   :  { %v3138_v29 = vadd.f32 %v3137_v28, %v5235_v13  ;;  %v3139_v57 = vpop.f32.mrb[22].mxu0  ;;  %v3180_v31 = vpop.f32.mrb[22].mxu1  ;;  %4292 = vmatpush3.bf16.msra.mxu0 %v4789_v22  ;;  %v4790_v13 = vld [vmem:[#allocation13 + $0x20] sm:$0xff]  }
 0x2f4   :  { %v3177_v30 = vadd.f32 %v3176_v27, %v3136_v52  ;;  %v3140_v32 = vpop.f32.mrb[23].mxu0  ;;  %v3181_v34 = vpop.f32.mrb[23].mxu1  ;;  %4293 = vmatprep.subr.bf16.mxu0 %v4994_v36 }
 0x2f5   :  { %v3179_v33 = vadd.f32 %v3178_v51, %v3138_v29 }
 0x2f7   :  { %4294 = vmatpush3.bf16.msra.mxu0 %v4790_v13 }
 0x2f8   :  { %4295 = vmatprep.subr.bf16.mxu0 %v4994_v36 }
 0x2fb   :  { %4296 = vmatpush3.bf16.msra.mxu0 %v4791_v38 }
 0x2fc   :  { %4297 = vmatprep.subr.bf16.mxu0 %v4994_v36 }
 0x2ff   :  { %4298 = vmatpush3.bf16.msra.mxu0 %v4792_v48 }
 0x300   :  { %4299 = vmatprep.subr.bf16.mxu0 %v4994_v36 }
 0x303   :  { %4300 = vmatpush3.bf16.msra.mxu0 %v4793_v62 }
 0x331   :  { %v3217_v39 = vpop.f32.mrb[24].mxu0 }
 0x332   :  { %v3218_v40 = vadd.f32 %v3217_v39, %v3177_v30  ;;  %v3258_v41 = vpop.f32.mrb[24].mxu1  ;;  %v3219_v50 = vpop.f32.mrb[25].mxu0 }
 0x333   :  { %v3220_v53 = vadd.f32 %v3219_v50, %v3179_v33  ;;  %v3260_v54 = vpop.f32.mrb[25].mxu1  ;;  %v3221_v21 = vpop.f32.mrb[26].mxu0 }
 0x334   :  { %v3259_v55 = vadd.f32 %v3258_v41, %v3218_v40  ;;  %v3262_v56 = vpop.f32.mrb[26].mxu1  ;;  %v3222_v58 = vpop.f32.mrb[27].mxu0 }
 0x335   :  { %v3261_v59 = vadd.f32 %v3260_v54, %v3220_v53  ;;  %v3263_v60 = vpop.f32.mrb[27].mxu1 }
 0x336   :  { %v3289_v61 = vadd.f32 %v3278_v42, %v3259_v55 }
 0x337   :  { %v3290_v63 = vadd.f32 %v3282_v20, %v3261_v59 }
 0x338   :  { %v3293_v0 = vmax.f32 %v3289_v61, 0.0 }
 0x339   :  { %v3294_v1 = vmax.f32 %v3290_v63, 0.0 }
 0x33a   :  { %v3297_v2 = vpack.c.bf16 %v3293_v0, %v3293_v0 }
 0x33b   :  { %v3298_v7 = vpack.c.bf16 %v3294_v1, %v3294_v1 }
 0x33d   :  { %3634 = vmatprep.mubr.bf16.mxu1 %v3298_v7 }
 0x33e   :  { %3635 = vmatmul.mubr.bf16.vlgmr.msra.gmra.mrb[28].mxu1 %v3297_v2 }
 0x391   :  { %v4248_v46 = vpop.f32.mrb[28].mxu0 }
 0x392   :  { %v4249_v3 = vpop.f32.mrb[29].mxu0 }
 0x393   :  { %v4250_v10 = vadd.f32 %v4249_v3, %v4248_v46  ;;  %v4251_v43 = vpop.f32.mrb[30].mxu0 }
 0x394   :  { %v4252_v4 = vpop.f32.mrb[31].mxu0 }
 0x395   :  { %v3597_v12 = vadd.f32 %v4250_v10, %v4190_v5 }
 0x411   :  { %v4270_v8 = vpop.f32.mrb[28].mxu1 }
 0x412   :  { %v4271_v11 = vpop.f32.mrb[29].mxu1 }
 0x413   :  { %v4272_v14 = vadd.f32 %v4271_v11, %v4270_v8  ;;  %v4273_v15 = vpop.f32.mrb[30].mxu1 }
 0x414   :  { %v4274_v16 = vpop.f32.mrb[31].mxu1 }
 0x415   :  { %v3637_v17 = vadd.f32 %v4272_v14, %v3597_v12 }
 0x417   :  { %v3642_v18 = vmax.f32 %v3637_v17, 0.0 }
 0x419   :  { %v3643_v19 = vpack.c.bf16 %v3642_v18, %v3642_v18 }
 0x41b   :  { %4302 = vmatmul.mubr.bf16.vlgmr.msra.gmra.mrb[32].mxu0 %v3643_v19 }
 0x4ee   :  { %v3749_v9 = vpop.f32.mrb[32].mxu0 }
 0x4ef   :  { %v3750_v23 = vadd.f32 %v4223_v44, %v3749_v9  ;;  %v4303_v6 = vpop.f32.mrb[33].mxu0 }
 0x4f0   :  { %v3752_v24 = vpop.f32.mrb[34].mxu0 }
 0x4f1   :  { %3755 = vst [vmem:[#allocation14] sm:$0xff] %v3750_v23  ;;  %v4304_v49 = vpop.f32.mrb[35].mxu0 }
 0x4f2   :  { %4959 = shalt.err (!%p4956_p4)
}
 0x4f3   :  { %s4960_s10 = scalar_lea.hbm %s5293_s11, 128 }
 0x4f4   :  { %p4961_p5 = scmp.ne.s32.totalorder %s5293_s11, %s4960_s10  ;;  %p4964_p6 = scmp.lt.u32.totalorder %s4960_s10, %s5293_s11 }
 0x4f6   :  { %p4966_p7 = pnand %p4964_p6, %p4961_p5 }
 0x4f8   :  { %4969 = shalt.err (!%p4966_p7)
}
 0x4f9   :  { %3765 = dma.vmem_to_hbm [thread:$0]  %s3763_s12, 128, %s5293_s11, [#allocation4]  }
 0x4fa   :  { %4978 = dma.done.wait [#allocation4], 128  }
 0x4fb   :  { %4979 = vsyncadd [#allocation4], 4294967168 }
 0x4fc   :  { %3769 = vsyncpa [#allocation3], 1 }
 0x4fd   :  { %3770 = vsyncpa [#allocation6], 1 }
 0x4fe   :  { %3771 = vsyncpa [#allocation9], 1 }
 0x4ff   :  { %3772 = vsyncpa [#allocation12], 1 }
 0x500   :  { %3773 = vsyncpa [#allocation4], 1 }

</bundles_post_ra>
